<compile_context>
chip_gen: v7x
topology: tpu7x:2x2x1
jax: 0.10.0
libtpu: 0.0.40
codegen_flags: <defaults>
</compile_context>

<pallas_src>
import jax
import jax.numpy as jnp
import numpy as np
from jax.experimental import pallas as pl
from jax.experimental.pallas import tpu as pltpu

LEAKY_SLOPE = 0.001   # act_param passed by Bottleneck to conv2d_iabn
BN_EPS = 1e-5
EXPANSION = 4


def _leaky_relu(x, slope=LEAKY_SLOPE):
    return jnp.where(x >= 0, x, slope * x)


# ---------------------------------------------------------------------------
# Kernel 1: conv1 (1x1) as GEMM + folded BN + leaky_relu
#   x_ref: (HW, Cin)  w_ref: (Cin, P)  s_ref/b_ref: (1, P)  o_ref: (HW, P)
# ---------------------------------------------------------------------------
def _conv1_kernel(x_ref, w_ref, s_ref, b_ref, o_ref):
    y = jnp.dot(x_ref[...], w_ref[...], preferred_element_type=jnp.float32)
    y = y * s_ref[...] + b_ref[...]
    o_ref[...] = _leaky_relu(y).astype(o_ref.dtype)


# ---------------------------------------------------------------------------
# Kernel 2: conv2 (3x3 via im2col GEMM)+BN+lrelu -> SE -> conv3 (1x1)+BN
#           -> + residual -> ReLU          (one batch element per grid step)
# ---------------------------------------------------------------------------
def _tail_kernel(xcol_ref, res_ref, w2_ref, s2_ref, b2_ref,
                 wfc1_ref, bfc1_ref, wfc2_ref, bfc2_ref,
                 w3_ref, s3_ref, b3_ref, o_ref):
    # conv2 as GEMM over the 9*P im2col channels
    y2 = jnp.dot(xcol_ref[...], w2_ref[...], preferred_element_type=jnp.float32)
    y2 = _leaky_relu(y2 * s2_ref[...] + b2_ref[...])             # (HW, P)

    # SE: global average pool over the spatial rows of this batch element
    se = jnp.mean(y2, axis=0, keepdims=True)                     # (1, P)
    z = jnp.dot(se, wfc1_ref[...], preferred_element_type=jnp.float32) + bfc1_ref[...]
    z = jnp.maximum(z, 0.0)                                      # (1, R)
    g = jnp.dot(z, wfc2_ref[...], preferred_element_type=jnp.float32) + bfc2_ref[...]
    g = 1.0 / (1.0 + jnp.exp(-g))                                # sigmoid, (1, P)
    y2 = y2 * g                                                  # broadcast over rows

    # conv3 (identity activation) + residual add + ReLU
    y3 = jnp.dot(y2, w3_ref[...], preferred_element_type=jnp.float32)
    y3 = y3 * s3_ref[...] + b3_ref[...]
    o_ref[...] = jnp.maximum(y3 + res_ref[...], 0.0).astype(o_ref.dtype)


def _bcast_spec(shape):
    """BlockSpec for a small parameter replicated across the batch grid."""
    return pl.BlockSpec(shape, lambda n: (0,) * len(shape))


def _fold_bn(gamma, beta, mean, var):
    scale = gamma / jnp.sqrt(var + BN_EPS)
    shift = beta - mean * scale
    return scale[None, :], shift[None, :]        # (1, C) for lane broadcast


@jax.jit
def bottleneck_forward(x, params):
    """Bottleneck.forward (stride=1, downsample=None, use_se=True) on NCHW input."""
    N, Cin, H, W = x.shape
    P = params['conv1_w'].shape[0]               # planes
    R = params['fc1_w'].shape[0]                 # SE reduction channels
    Cout = P * EXPANSION
    assert Cin == Cout, "identity-residual path requires inplanes == planes * expansion"
    HW = H * W

    # layout glue: NCHW -> (N, H*W, C) channels-last rows
    x_rows = jnp.transpose(x, (0, 2, 3, 1)).reshape(N, HW, Cin)

    # parameters folded into GEMM layout
    w1 = params['conv1_w'][:, :, 0, 0].T                                   # (Cin, P)
    s1, b1 = _fold_bn(params['bn1_gamma'], params['bn1_beta'],
                      params['bn1_mean'], params['bn1_var'])
    w2 = jnp.transpose(params['conv2_w'], (2, 3, 1, 0)).reshape(9 * P, P)  # (9P, P)
    s2, b2 = _fold_bn(params['bn2_gamma'], params['bn2_beta'],
                      params['bn2_mean'], params['bn2_var'])
    w3 = params['conv3_w'][:, :, 0, 0].T                                   # (P, Cout)
    s3, b3 = _fold_bn(params['bn3_gamma'], params['bn3_beta'],
                      params['bn3_mean'], params['bn3_var'])
    wfc1 = params['fc1_w'][:, :, 0, 0].T                                   # (P, R)
    bfc1 = params['fc1_b'][None, :]                                        # (1, R)
    wfc2 = params['fc2_w'][:, :, 0, 0].T                                   # (R, P)
    bfc2 = params['fc2_b'][None, :]                                        # (1, P)

    # ---- kernel 1: conv1 (1x1) + BN + leaky_relu ----
    y1 = pl.pallas_call(
        _conv1_kernel,
        out_shape=jax.ShapeDtypeStruct((N, HW, P), x.dtype),
        grid=(N,),
        in_specs=[
            pl.BlockSpec((None, HW, Cin), lambda n: (n, 0, 0)),
            _bcast_spec((Cin, P)),
            _bcast_spec((1, P)),
            _bcast_spec((1, P)),
        ],
        out_specs=pl.BlockSpec((None, HW, P), lambda n: (n, 0, 0)),
        compiler_params=pltpu.CompilerParams(dimension_semantics=("parallel",)),
    )(x_rows, w1, s1, b1)

    # glue: im2col of conv1 output for the 3x3 conv (pure data movement)
    y1_img = y1.reshape(N, H, W, P)
    y1_pad = jnp.pad(y1_img, ((0, 0), (1, 1), (1, 1), (0, 0)))
    cols = [y1_pad[:, kh:kh + H, kw:kw + W, :] for kh in range(3) for kw in range(3)]
    xcol = jnp.concatenate(cols, axis=-1).reshape(N, HW, 9 * P)

    # ---- kernel 2: conv2 + BN + lrelu + SE + conv3 + BN + residual + ReLU ----
    out_rows = pl.pallas_call(
        _tail_kernel,
        out_shape=jax.ShapeDtypeStruct((N, HW, Cout), x.dtype),
        grid=(N,),
        in_specs=[
            pl.BlockSpec((None, HW, 9 * P), lambda n: (n, 0, 0)),
            pl.BlockSpec((None, HW, Cin), lambda n: (n, 0, 0)),
            _bcast_spec((9 * P, P)),
            _bcast_spec((1, P)),
            _bcast_spec((1, P)),
            _bcast_spec((P, R)),
            _bcast_spec((1, R)),
            _bcast_spec((R, P)),
            _bcast_spec((1, P)),
            _bcast_spec((P, Cout)),
            _bcast_spec((1, Cout)),
            _bcast_spec((1, Cout)),
        ],
        out_specs=pl.BlockSpec((None, HW, Cout), lambda n: (n, 0, 0)),
        compiler_params=pltpu.CompilerParams(dimension_semantics=("parallel",)),
    )(xcol, x_rows, w2, s2, b2, wfc1, bfc1, wfc2, bfc2, w3, s3, b3)

    # layout glue: back to NCHW
    return jnp.transpose(out_rows.reshape(N, H, W, Cout), (0, 3, 1, 2))


# ---------------------------------------------------------------------------
# Parameter construction + pure-JAX reference (transcription of the PyTorch forward)
# ---------------------------------------------------------------------------
def init_params(key, inplanes, planes):
    red = max(planes * EXPANSION // 8, 64)       # reduction_chs as in the module
    ks = jax.random.split(key, 24)

    def nrm(k, shape, scale):
        return jax.random.normal(k, shape, jnp.float32) * scale

    p = {
        'conv1_w': nrm(ks[0], (planes, inplanes, 1, 1), 1.0 / np.sqrt(inplanes)),
        'conv2_w': nrm(ks[1], (planes, planes, 3, 3), 1.0 / np.sqrt(9 * planes)),
        'conv3_w': nrm(ks[2], (planes * EXPANSION, planes, 1, 1), 1.0 / np.sqrt(planes)),
        'fc1_w': nrm(ks[3], (red, planes, 1, 1), 1.0 / np.sqrt(planes)),
        'fc1_b': nrm(ks[4], (red,), 0.1),
        'fc2_w': nrm(ks[5], (planes, red, 1, 1), 1.0 / np.sqrt(red)),
        'fc2_b': nrm(ks[6], (planes,), 0.1),
    }
    for i, c in enumerate((planes, planes, planes * EXPANSION), start=1):
        p[f'bn{i}_gamma'] = jax.random.uniform(ks[6 + i], (c,), jnp.float32, 0.5, 1.5)
        p[f'bn{i}_beta'] = nrm(ks[9 + i], (c,), 0.1)
        p[f'bn{i}_mean'] = nrm(ks[12 + i], (c,), 0.1)
        p[f'bn{i}_var'] = jax.random.uniform(ks[15 + i], (c,), jnp.float32, 0.5, 1.5)
    return p


def reference_forward(x, p):
    hp = jax.lax.Precision.HIGHEST

    def conv(v, w, pad):
        return jax.lax.conv_general_dilated(
            v, w, window_strides=(1, 1), padding=[(pad, pad), (pad, pad)],
            dimension_numbers=('NCHW', 'OIHW', 'NCHW'), precision=hp)

    def bn(v, i):
        s = p[f'bn{i}_gamma'] / jnp.sqrt(p[f'bn{i}_var'] + BN_EPS)
        sh = p[f'bn{i}_beta'] - p[f'bn{i}_mean'] * s
        return v * s[None, :, None, None] + sh[None, :, None, None]

    def lrelu(v):
        return jnp.where(v >= 0, v, LEAKY_SLOPE * v)

    out = lrelu(bn(conv(x, p['conv1_w'], 0), 1))
    out = lrelu(bn(conv(out, p['conv2_w'], 1), 2))
    se = out.mean(axis=(2, 3), keepdims=True)
    se = jnp.maximum(conv(se, p['fc1_w'], 0) + p['fc1_b'][None, :, None, None], 0.0)
    se = jax.nn.sigmoid(conv(se, p['fc2_w'], 0) + p['fc2_b'][None, :, None, None])
    out = out * se
    out = bn(conv(out, p['conv3_w'], 0), 3)
    return jnp.maximum(out + x, 0.0)


if __name__ == "__main__":
    key = jax.random.PRNGKey(0)
    k_x, k_p = jax.random.split(key)

    inplanes, planes = 32, 8          # planes * expansion == inplanes -> identity residual
    N, H, W = 2, 16, 16
    x = jax.random.normal(k_x, (N, inplanes, H, W), jnp.float32)
    params = init_params(k_p, inplanes, planes)

    y = bottleneck_forward(x, params)
    jax.block_until_ready(y)

    ref = reference_forward(x, params)
    assert y.shape == ref.shape == (N, inplanes, H, W)
    assert y.dtype == ref.dtype
    # Tolerance accounts for MXU pass decomposition vs. the XLA conv reference.
    np.testing.assert_allclose(np.asarray(y), np.asarray(ref), rtol=2e-2, atol=2e-2)
    print("KERNEL_OK")
</pallas_src>

<mosaic_0001>
module attributes {stable_mosaic.version = 11 : i64} {
  func.func @_conv1_kernel(%arg0: i32, %arg1: memref<1x256x32xf32, #tpu.memory_space<vmem>>, %arg2: memref<32x8xf32, #tpu.memory_space<vmem>>, %arg3: memref<1x8xf32, #tpu.memory_space<vmem>>, %arg4: memref<1x8xf32, #tpu.memory_space<vmem>>, %arg5: memref<1x256x8xf32, #tpu.memory_space<vmem>>) attributes {dimension_semantics = [#tpu.dimension_semantics<parallel>], iteration_bounds = array<i64: 2>, scalar_prefetch = 0 : i64, scratch_operands = 0 : i64, tpu.core_type = #tpu.core_type<tc>, window_params = [{transform_indices = @transform_0, window_bounds = array<i64: 1, 256, 32>}, {pipeline_mode = #tpu.pipeline_mode<synchronous>, transform_indices = @transform_1, window_bounds = array<i64: 32, 8>}, {pipeline_mode = #tpu.pipeline_mode<synchronous>, transform_indices = @transform_2, window_bounds = array<i64: 1, 8>}, {pipeline_mode = #tpu.pipeline_mode<synchronous>, transform_indices = @transform_3, window_bounds = array<i64: 1, 8>}, {transform_indices = @transform_4, window_bounds = array<i64: 1, 256, 8>}]} {
    %c0 = arith.constant 0 : index
    %c0_0 = arith.constant 0 : index
    %c0_1 = arith.constant 0 : index
    %0 = vector.load %arg1[%c0, %c0_0, %c0_1] : memref<1x256x32xf32, #tpu.memory_space<vmem>>, vector<1x256x32xf32>
    %1 = vector.shape_cast %0 : vector<1x256x32xf32> to vector<256x32xf32>
    %c0_2 = arith.constant 0 : index
    %c0_3 = arith.constant 0 : index
    %2 = vector.load %arg2[%c0_2, %c0_3] : memref<32x8xf32, #tpu.memory_space<vmem>>, vector<32x8xf32>
    %cst = arith.constant dense<0.000000e+00> : vector<256x8xf32>
    %3 = tpu.matmul %1, %2, %cst {dimension_numbers = #tpu.dot_dimension_numbers<[1], [0], [0], [1], [0, 0, 1, 1], [], []>} : vector<256x32xf32>, vector<32x8xf32>, vector<256x8xf32> -> vector<256x8xf32>
    %c0_4 = arith.constant 0 : index
    %c0_5 = arith.constant 0 : index
    %4 = vector.load %arg3[%c0_4, %c0_5] : memref<1x8xf32, #tpu.memory_space<vmem>>, vector<1x8xf32>
    %5 = vector.broadcast %4 : vector<1x8xf32> to vector<256x8xf32>
    %6 = arith.mulf %3, %5 : vector<256x8xf32>
    %c0_6 = arith.constant 0 : index
    %c0_7 = arith.constant 0 : index
    %7 = vector.load %arg4[%c0_6, %c0_7] : memref<1x8xf32, #tpu.memory_space<vmem>>, vector<1x8xf32>
    %8 = vector.broadcast %7 : vector<1x8xf32> to vector<256x8xf32>
    %9 = arith.addf %6, %8 : vector<256x8xf32>
    %cst_8 = arith.constant 0.000000e+00 : f32
    %10 = vector.broadcast %cst_8 : f32 to vector<256x8xf32>
    %11 = arith.cmpf oge, %9, %10 : vector<256x8xf32>
    %cst_9 = arith.constant 1.000000e-03 : f32
    %12 = vector.broadcast %cst_9 : f32 to vector<256x8xf32>
    %13 = arith.mulf %12, %9 : vector<256x8xf32>
    %14 = arith.select %11, %9, %13 : vector<256x8xi1>, vector<256x8xf32>
    %c0_10 = arith.constant 0 : index
    %c0_11 = arith.constant 0 : index
    %c0_12 = arith.constant 0 : index
    %15 = vector.load %arg5[%c0_10, %c0_11, %c0_12] : memref<1x256x8xf32, #tpu.memory_space<vmem>>, vector<1x256x8xf32>
    %16 = vector.shape_cast %15 : vector<1x256x8xf32> to vector<256x8xf32>
    %17 = vector.shape_cast %14 : vector<256x8xf32> to vector<1x256x8xf32>
    tpu.vector_store %arg5[%c0_10, %c0_11, %c0_12], %17 {strides = array<i32>} : memref<1x256x8xf32, #tpu.memory_space<vmem>>, vector<1x256x8xf32>,
    return
  }
  func.func @transform_0(%arg0: i32) -> (i32, i32, i32) {
    %c0_i32 = arith.constant 0 : i32
    %c0_i32_0 = arith.constant 0 : i32
    %c0_i32_1 = arith.constant 0 : i32
    return %arg0, %c0_i32, %c0_i32_0 : i32, i32, i32
  }
  func.func @transform_1(%arg0: i32) -> (i32, i32) {
    %c0_i32 = arith.constant 0 : i32
    %c0_i32_0 = arith.constant 0 : i32
    %c0_i32_1 = arith.constant 0 : i32
    return %c0_i32, %c0_i32_0 : i32, i32
  }
  func.func @transform_2(%arg0: i32) -> (i32, i32) {
    %c0_i32 = arith.constant 0 : i32
    %c0_i32_0 = arith.constant 0 : i32
    %c0_i32_1 = arith.constant 0 : i32
    return %c0_i32, %c0_i32_0 : i32, i32
  }
  func.func @transform_3(%arg0: i32) -> (i32, i32) {
    %c0_i32 = arith.constant 0 : i32
    %c0_i32_0 = arith.constant 0 : i32
    %c0_i32_1 = arith.constant 0 : i32
    return %c0_i32, %c0_i32_0 : i32, i32
  }
  func.func @transform_4(%arg0: i32) -> (i32, i32, i32) {
    %c0_i32 = arith.constant 0 : i32
    %c0_i32_0 = arith.constant 0 : i32
    %c0_i32_1 = arith.constant 0 : i32
    return %arg0, %c0_i32, %c0_i32_0 : i32, i32, i32
  }
}

module attributes {stable_mosaic.version = 11 : i64} {
  func.func @_tail_kernel(%arg0: i32, %arg1: memref<1x256x72xf32, #tpu.memory_space<vmem>>, %arg2: memref<1x256x32xf32, #tpu.memory_space<vmem>>, %arg3: memref<72x8xf32, #tpu.memory_space<vmem>>, %arg4: memref<1x8xf32, #tpu.memory_space<vmem>>, %arg5: memref<1x8xf32, #tpu.memory_space<vmem>>, %arg6: memref<8x64xf32, #tpu.memory_space<vmem>>, %arg7: memref<1x64xf32, #tpu.memory_space<vmem>>, %arg8: memref<64x8xf32, #tpu.memory_space<vmem>>, %arg9: memref<1x8xf32, #tpu.memory_space<vmem>>, %arg10: memref<8x32xf32, #tpu.memory_space<vmem>>, %arg11: memref<1x32xf32, #tpu.memory_space<vmem>>, %arg12: memref<1x32xf32, #tpu.memory_space<vmem>>, %arg13: memref<1x256x32xf32, #tpu.memory_space<vmem>>) attributes {dimension_semantics = [#tpu.dimension_semantics<parallel>], iteration_bounds = array<i64: 2>, scalar_prefetch = 0 : i64, scratch_operands = 0 : i64, tpu.core_type = #tpu.core_type<tc>, window_params = [{transform_indices = @transform_0, window_bounds = array<i64: 1, 256, 72>}, {transform_indices = @transform_1, window_bounds = array<i64: 1, 256, 32>}, {pipeline_mode = #tpu.pipeline_mode<synchronous>, transform_indices = @transform_2, window_bounds = array<i64: 72, 8>}, {pipeline_mode = #tpu.pipeline_mode<synchronous>, transform_indices = @transform_3, window_bounds = array<i64: 1, 8>}, {pipeline_mode = #tpu.pipeline_mode<synchronous>, transform_indices = @transform_4, window_bounds = array<i64: 1, 8>}, {pipeline_mode = #tpu.pipeline_mode<synchronous>, transform_indices = @transform_5, window_bounds = array<i64: 8, 64>}, {pipeline_mode = #tpu.pipeline_mode<synchronous>, transform_indices = @transform_6, window_bounds = array<i64: 1, 64>}, {pipeline_mode = #tpu.pipeline_mode<synchronous>, transform_indices = @transform_7, window_bounds = array<i64: 64, 8>}, {pipeline_mode = #tpu.pipeline_mode<synchronous>, transform_indices = @transform_8, window_bounds = array<i64: 1, 8>}, {pipeline_mode = #tpu.pipeline_mode<synchronous>, transform_indices = @transform_9, window_bounds = array<i64: 8, 32>}, {pipeline_mode = #tpu.pipeline_mode<synchronous>, transform_indices = @transform_10, window_bounds = array<i64: 1, 32>}, {pipeline_mode = #tpu.pipeline_mode<synchronous>, transform_indices = @transform_11, window_bounds = array<i64: 1, 32>}, {transform_indices = @transform_12, window_bounds = array<i64: 1, 256, 32>}]} {
    %c0 = arith.constant 0 : index
    %c0_0 = arith.constant 0 : index
    %c0_1 = arith.constant 0 : index
    %0 = vector.load %arg1[%c0, %c0_0, %c0_1] : memref<1x256x72xf32, #tpu.memory_space<vmem>>, vector<1x256x72xf32>
    %1 = vector.shape_cast %0 : vector<1x256x72xf32> to vector<256x72xf32>
    %c0_2 = arith.constant 0 : index
    %c0_3 = arith.constant 0 : index
    %2 = vector.load %arg3[%c0_2, %c0_3] : memref<72x8xf32, #tpu.memory_space<vmem>>, vector<72x8xf32>
    %cst = arith.constant dense<0.000000e+00> : vector<256x8xf32>
    %3 = tpu.matmul %1, %2, %cst {dimension_numbers = #tpu.dot_dimension_numbers<[1], [0], [0], [1], [0, 0, 1, 1], [], []>} : vector<256x72xf32>, vector<72x8xf32>, vector<256x8xf32> -> vector<256x8xf32>
    %c0_4 = arith.constant 0 : index
    %c0_5 = arith.constant 0 : index
    %4 = vector.load %arg4[%c0_4, %c0_5] : memref<1x8xf32, #tpu.memory_space<vmem>>, vector<1x8xf32>
    %5 = vector.broadcast %4 : vector<1x8xf32> to vector<256x8xf32>
    %6 = arith.mulf %3, %5 : vector<256x8xf32>
    %c0_6 = arith.constant 0 : index
    %c0_7 = arith.constant 0 : index
    %7 = vector.load %arg5[%c0_6, %c0_7] : memref<1x8xf32, #tpu.memory_space<vmem>>, vector<1x8xf32>
    %8 = vector.broadcast %7 : vector<1x8xf32> to vector<256x8xf32>
    %9 = arith.addf %6, %8 : vector<256x8xf32>
    %cst_8 = arith.constant 0.000000e+00 : f32
    %10 = vector.broadcast %cst_8 : f32 to vector<256x8xf32>
    %11 = arith.cmpf oge, %9, %10 : vector<256x8xf32>
    %cst_9 = arith.constant 1.000000e-03 : f32
    %12 = vector.broadcast %cst_9 : f32 to vector<256x8xf32>
    %13 = arith.mulf %12, %9 : vector<256x8xf32>
    %14 = arith.select %11, %9, %13 : vector<256x8xi1>, vector<256x8xf32>
    %cst_10 = arith.constant dense<0.000000e+00> : vector<8xf32>
    %15 = vector.multi_reduction <add>, %14, %cst_10 [0] : vector<256x8xf32> to vector<8xf32>
    %16 = vector.shape_cast %15 : vector<8xf32> to vector<1x8xf32>
    %cst_11 = arith.constant 2.560000e+02 : f32
    %17 = vector.broadcast %cst_11 : f32 to vector<1x8xf32>
    %18 = arith.divf %16, %17 : vector<1x8xf32>
    %c0_12 = arith.constant 0 : index
    %c0_13 = arith.constant 0 : index
    %19 = vector.load %arg6[%c0_12, %c0_13] : memref<8x64xf32, #tpu.memory_space<vmem>>, vector<8x64xf32>
    %cst_14 = arith.constant dense<0.000000e+00> : vector<1x64xf32>
    %20 = tpu.matmul %18, %19, %cst_14 {dimension_numbers = #tpu.dot_dimension_numbers<[1], [0], [0], [1], [0, 0, 1, 1], [], []>} : vector<1x8xf32>, vector<8x64xf32>, vector<1x64xf32> -> vector<1x64xf32>
    %c0_15 = arith.constant 0 : index
    %c0_16 = arith.constant 0 : index
    %21 = vector.load %arg7[%c0_15, %c0_16] : memref<1x64xf32, #tpu.memory_space<vmem>>, vector<1x64xf32>
    %22 = arith.addf %20, %21 : vector<1x64xf32>
    %cst_17 = arith.constant 0.000000e+00 : f32
    %23 = vector.broadcast %cst_17 : f32 to vector<1x64xf32>
    %24 = arith.maximumf %22, %23 : vector<1x64xf32>
    %c0_18 = arith.constant 0 : index
    %c0_19 = arith.constant 0 : index
    %25 = vector.load %arg8[%c0_18, %c0_19] : memref<64x8xf32, #tpu.memory_space<vmem>>, vector<64x8xf32>
    %cst_20 = arith.constant dense<0.000000e+00> : vector<1x8xf32>
    %26 = tpu.matmul %24, %25, %cst_20 {dimension_numbers = #tpu.dot_dimension_numbers<[1], [0], [0], [1], [0, 0, 1, 1], [], []>} : vector<1x64xf32>, vector<64x8xf32>, vector<1x8xf32> -> vector<1x8xf32>
    %c0_21 = arith.constant 0 : index
    %c0_22 = arith.constant 0 : index
    %27 = vector.load %arg9[%c0_21, %c0_22] : memref<1x8xf32, #tpu.memory_space<vmem>>, vector<1x8xf32>
    %28 = arith.addf %26, %27 : vector<1x8xf32>
    %cst_23 = arith.constant 0.000000e+00 : f32
    %29 = vector.broadcast %cst_23 : f32 to vector<1x8xf32>
    %30 = arith.subf %29, %28 : vector<1x8xf32>
    %31 = math.exp %30 : vector<1x8xf32>
    %cst_24 = arith.constant 1.000000e+00 : f32
    %32 = vector.broadcast %cst_24 : f32 to vector<1x8xf32>
    %33 = arith.addf %32, %31 : vector<1x8xf32>
    %cst_25 = arith.constant 1.000000e+00 : f32
    %34 = vector.broadcast %cst_25 : f32 to vector<1x8xf32>
    %35 = arith.divf %34, %33 : vector<1x8xf32>
    %36 = vector.broadcast %35 : vector<1x8xf32> to vector<256x8xf32>
    %37 = arith.mulf %14, %36 : vector<256x8xf32>
    %c0_26 = arith.constant 0 : index
    %c0_27 = arith.constant 0 : index
    %38 = vector.load %arg10[%c0_26, %c0_27] : memref<8x32xf32, #tpu.memory_space<vmem>>, vector<8x32xf32>
    %cst_28 = arith.constant dense<0.000000e+00> : vector<256x32xf32>
    %39 = tpu.matmul %37, %38, %cst_28 {dimension_numbers = #tpu.dot_dimension_numbers<[1], [0], [0], [1], [0, 0, 1, 1], [], []>} : vector<256x8xf32>, vector<8x32xf32>, vector<256x32xf32> -> vector<256x32xf32>
    %c0_29 = arith.constant 0 : index
    %c0_30 = arith.constant 0 : index
    %40 = vector.load %arg11[%c0_29, %c0_30] : memref<1x32xf32, #tpu.memory_space<vmem>>, vector<1x32xf32>
    %41 = vector.broadcast %40 : vector<1x32xf32> to vector<256x32xf32>
    %42 = arith.mulf %39, %41 : vector<256x32xf32>
    %c0_31 = arith.constant 0 : index
    %c0_32 = arith.constant 0 : index
    %43 = vector.load %arg12[%c0_31, %c0_32] : memref<1x32xf32, #tpu.memory_space<vmem>>, vector<1x32xf32>
    %44 = vector.broadcast %43 : vector<1x32xf32> to vector<256x32xf32>
    %45 = arith.addf %42, %44 : vector<256x32xf32>
    %c0_33 = arith.constant 0 : index
    %c0_34 = arith.constant 0 : index
    %c0_35 = arith.constant 0 : index
    %46 = vector.load %arg2[%c0_33, %c0_34, %c0_35] : memref<1x256x32xf32, #tpu.memory_space<vmem>>, vector<1x256x32xf32>
    %47 = vector.shape_cast %46 : vector<1x256x32xf32> to vector<256x32xf32>
    %48 = arith.addf %45, %47 : vector<256x32xf32>
    %cst_36 = arith.constant 0.000000e+00 : f32
    %49 = vector.broadcast %cst_36 : f32 to vector<256x32xf32>
    %50 = arith.maximumf %48, %49 : vector<256x32xf32>
    %c0_37 = arith.constant 0 : index
    %c0_38 = arith.constant 0 : index
    %c0_39 = arith.constant 0 : index
    %51 = vector.load %arg13[%c0_37, %c0_38, %c0_39] : memref<1x256x32xf32, #tpu.memory_space<vmem>>, vector<1x256x32xf32>
    %52 = vector.shape_cast %51 : vector<1x256x32xf32> to vector<256x32xf32>
    %53 = vector.shape_cast %50 : vector<256x32xf32> to vector<1x256x32xf32>
    tpu.vector_store %arg13[%c0_37, %c0_38, %c0_39], %53 {strides = array<i32>} : memref<1x256x32xf32, #tpu.memory_space<vmem>>, vector<1x256x32xf32>,
    return
  }
  func.func @transform_0(%arg0: i32) -> (i32, i32, i32) {
    %c0_i32 = arith.constant 0 : i32
    %c0_i32_0 = arith.constant 0 : i32
    %c0_i32_1 = arith.constant 0 : i32
    return %arg0, %c0_i32, %c0_i32_0 : i32, i32, i32
  }
  func.func @transform_1(%arg0: i32) -> (i32, i32, i32) {
    %c0_i32 = arith.constant 0 : i32
    %c0_i32_0 = arith.constant 0 : i32
    %c0_i32_1 = arith.constant 0 : i32
    return %arg0, %c0_i32, %c0_i32_0 : i32, i32, i32
  }
  func.func @transform_2(%arg0: i32) -> (i32, i32) {
    %c0_i32 = arith.constant 0 : i32
    %c0_i32_0 = arith.constant 0 : i32
    %c0_i32_1 = arith.constant 0 : i32
    return %c0_i32, %c0_i32_0 : i32, i32
  }
  func.func @transform_3(%arg0: i32) -> (i32, i32) {
    %c0_i32 = arith.constant 0 : i32
    %c0_i32_0 = arith.constant 0 : i32
    %c0_i32_1 = arith.constant 0 : i32
    return %c0_i32, %c0_i32_0 : i32, i32
  }
  func.func @transform_4(%arg0: i32) -> (i32, i32) {
    %c0_i32 = arith.constant 0 : i32
    %c0_i32_0 = arith.constant 0 : i32
    %c0_i32_1 = arith.constant 0 : i32
    return %c0_i32, %c0_i32_0 : i32, i32
  }
  func.func @transform_5(%arg0: i32) -> (i32, i32) {
    %c0_i32 = arith.constant 0 : i32
    %c0_i32_0 = arith.constant 0 : i32
    %c0_i32_1 = arith.constant 0 : i32
    return %c0_i32, %c0_i32_0 : i32, i32
  }
  func.func @transform_6(%arg0: i32) -> (i32, i32) {
    %c0_i32 = arith.constant 0 : i32
    %c0_i32_0 = arith.constant 0 : i32
    %c0_i32_1 = arith.constant 0 : i32
    return %c0_i32, %c0_i32_0 : i32, i32
  }
  func.func @transform_7(%arg0: i32) -> (i32, i32) {
    %c0_i32 = arith.constant 0 : i32
    %c0_i32_0 = arith.constant 0 : i32
    %c0_i32_1 = arith.constant 0 : i32
    return %c0_i32, %c0_i32_0 : i32, i32
  }
  func.func @transform_8(%arg0: i32) -> (i32, i32) {
    %c0_i32 = arith.constant 0 : i32
    %c0_i32_0 = arith.constant 0 : i32
    %c0_i32_1 = arith.constant 0 : i32
    return %c0_i32, %c0_i32_0 : i32, i32
  }
  func.func @transform_9(%arg0: i32) -> (i32, i32) {
    %c0_i32 = arith.constant 0 : i32
    %c0_i32_0 = arith.constant 0 : i32
    %c0_i32_1 = arith.constant 0 : i32
    return %c0_i32, %c0_i32_0 : i32, i32
  }
  func.func @transform_10(%arg0: i32) -> (i32, i32) {
    %c0_i32 = arith.constant 0 : i32
    %c0_i32_0 = arith.constant 0 : i32
    %c0_i32_1 = arith.constant 0 : i32
    return %c0_i32, %c0_i32_0 : i32, i32
  }
  func.func @transform_11(%arg0: i32) -> (i32, i32) {
    %c0_i32 = arith.constant 0 : i32
    %c0_i32_0 = arith.constant 0 : i32
    %c0_i32_1 = arith.constant 0 : i32
    return %c0_i32, %c0_i32_0 : i32, i32
  }
  func.func @transform_12(%arg0: i32) -> (i32, i32, i32) {
    %c0_i32 = arith.constant 0 : i32
    %c0_i32_0 = arith.constant 0 : i32
    %c0_i32_1 = arith.constant 0 : i32
    return %arg0, %c0_i32, %c0_i32_0 : i32, i32, i32
  }
}

</mosaic_0001>

<bundles_post_ra>
// kernel: bottleneck_forward.2
= control target key start
LH: loop header
LB: loop body
LE: loop exit
PB: predicated region body
PF: predicated region fallthrough
CT: control target
= control target key end

     0   :  { %9 = vsyncpa [#allocation3], 0  ;;  %s1463_s0 = inlined_call_operand.hbm [shape: f32[2,256,32], index: 0, kind: input, shape index: {}]   ;;  %s1464_s1 = inlined_call_operand.vmem [shape: f32[32,8], index: 1, kind: input, shape index: {}]   ;;  %s1465_s2 = inlined_call_operand.vmem [shape: f32[1,8], index: 2, kind: input, shape index: {}]   ;;  %s1466_s3 = inlined_call_operand.vmem [shape: f32[1,8], index: 3, kind: input, shape index: {}]   ;;  %s1467_s4 = inlined_call_operand.vmem [shape: f32[2,256,8], index: 4, kind: output, shape index: {}]  }
   0x1   :  { %11 = vsyncpa [#allocation3 + $0x1], 0  ;;  %s1137_s15 = smov 0   ;;  %s1139_s16 = smov 0  }
   0x2   :  { %s1141_s17 = smov 0   ;;  %s1143_s18 = smov 0  }
   0x3 LB: > { %s1156_s19 = sadd.s32 4294967295, %s1107_s18   ;;  %s1159_s20 = sadd.s32 1, %s1107_s18   ;;  %s1107_s18 = sphi %s1143_s18, %s1474_s18   ;;  %s1103_s17 = sphi %s1141_s17, %s1473_s17   ;;  %s1099_s16 = sphi %s1139_s16, %s1472_s16   ;;  %s1095_s15 = sphi %s1137_s15, %s1471_s15  }
   0x4   : > { %s21_s21 = ssub.s32 %s1107_s18, %s1159_s20  ;;  %s24_s22 = sadd.s32 1, %s1103_s17 }
   0x5   : > { %p22_p0 = scmp.eq.s32.totalorder %s21_s21, 0  ;;  %p31_p1 = scmp.ne.s32.totalorder %s1103_s17, %s1099_s16 }
   0x6   : > { %p32_p2 = scmp.eq.s32.totalorder %s1107_s18, 0  ;;  %p37_p3 = scmp.ne.s32.totalorder %s1099_s16, %s1095_s15 }
   0x7   : > { %s1169_s23 = scalar_select %p22_p0, %s1103_s17, %s24_s22  }
   0x8   : > { %p33_p4 = por %p32_p2, %p31_p1  ;;  %p38_p5 = scmp.eq.s32.totalorder %s1156_s19, 0 }
   0x9   : > { %p1008_p6 = scmp.lt.s32.totalorder %s1107_s18, 2  ;;  %s159_s25 = sand.u32 1, %s1103_s17  }
   0xa   : > { %p1173_p7 = por %p38_p5, %p37_p3  ;;  %s853_s26 = sshll.u32 %s159_s25, 8 }
   0xb   : > { %s896_s27 = sshll.u32 %s1107_s18, 12  ;;  %s163_s5 = scalar_lea.vmem [#allocation2], %s853_s26 }
   0xc   : > { %s1182_s30 = scalar_lea.hbm %s1463_s0, %s896_s27  ;;  %s170_s6 = sshll.u32 %s163_s5, 4  ;;  %s1184_s6 = int_to_ptr.vmem [resolvable:$true] %s170_s6 }
   0xd   : > { %p1186_p8 = pnand %p1008_p6, %p33_p4  ;;  %s1191_s8 = scalar_lea.sflag [#allocation3], %s159_s25 }
   0xe   : > { %s1043_s9 = scalar_lea.hbm %s1182_s30, 4096  ;;  %s1048_s12 = scalar_lea.hbm %s1463_s0, 8192 }
   0xf   : > { %p1044_p10 = scmp.ne.s32.totalorder %s1182_s30, %s1043_s9  ;;  %p1045_p11 = pneg %p1186_p8 }
  0x10   : > { %p1049_p0 = scmp.lt.u32.totalorder %s1182_s30, %s1463_s0  ;;  %p1050_p1 = scmp.lt.u32.totalorder %s1048_s12, %s1043_s9 }
  0x11   : > { %p1046_p12 = pnand %p1045_p11, %p1044_p10  ;;  %p1052_p3 = scmp.lt.u32.totalorder %s1043_s9, %s1182_s30 }
  0x12   : > { %p1051_p2 = por %p1050_p1, %p1049_p0 }
  0x13   : > { %p1047_p13 = pneg %p1046_p12 }
  0x14   : > { %p1053_p4 = por %p1052_p3, %p1051_p2 }
  0x16   : > { %p1054_p5 = pnand %p1053_p4, %p1047_p13 }
  0x18   : > { %1057 = shalt.err (!%p1054_p5)
}
  0x19   : > { %s1058_s15 = scalar_lea.vmem %s1184_s6, 4096  ;;  %s1109_s21 = smov [#allocation2]  }
  0x1a   : > { %p1059_p6 = scmp.ne.s32.totalorder %s1184_s6, %s1058_s15  ;;  %s1063_s22 = sshll.u32 %s1109_s21, 4  ;;  %s1064_s22 = int_to_ptr.vmem [resolvable:$false] %s1063_s22 }
  0x1b   : > { %s1065_s25 = scalar_lea.vmem %s1064_s22, 8192  ;;  %p1066_p9 = scmp.lt.s32.totalorder %s1184_s6, %s1064_s22 }
  0x1c   : > { %p1061_p10 = pnand %p1059_p6, %p1045_p11  ;;  %p1067_p0 = scmp.lt.s32.totalorder %s1065_s25, %s1058_s15 }
  0x1e   : > { %p1062_p12 = pneg %p1061_p10  ;;  %p1068_p1 = por %p1067_p0, %p1066_p9 }
  0x20   : > { %p1069_p2 = pnand %p1068_p1, %p1062_p12 }
  0x22   : > { %1072 = shalt.err (!%p1069_p2)
}
  0x23   : > { %s1110_s26 = smov 128   ;;  %s1111_s27 = smov 8  }
  0x24   : > { %1007 = dma.hbm_to_vmem [thread:$0]  (!%p1186_p8), %s1182_s30, 4096, %s1184_s6, %s1191_s8, %s1110_s26, %s1110_s26, %s1111_s27  }
  0x25   : > { %p178_p11 = scmp.lt.s32.totalorder %s1107_s18, 3  ;;  %p1470_p13 = scmp.ge.s32.totalorder %s1107_s18, 1 }
  0x27   : > { %p179_p3 = pnand %p1470_p13, %p178_p11 }
  0x28   : > { %s184_s28 = sand.u32 (!%p179_p3), 1, %s1099_s16  }
  0x29   : > { %182 = sbr.rel (%p179_p3) target bundleno = 318 (0x13e), region = 36  ;;  %s857_s29 = sshll.u32 (!%p179_p3), %s184_s28, 8 }
  0x2a   : > { %s185_s5 = scalar_lea.sflag (!%p179_p3), [#allocation3], %s184_s28  ;;  %s1223_s9 = scalar_lea.vmem (!%p179_p3), [#allocation2], %s857_s29 }
  0x30   : > { %1090 = dma.done.wait (%p1173_p7), %s185_s5, 4096  }
  0x31   : > { %1092 = vsyncadd (%p1173_p7), %s185_s5, 4294963200  ;;  %vm254_vm0 = vcmask 261120   ;;  %v250_v0 = vld [vmem:[%s1464_s1] sm:$0xff]  ;;  %v251_v1 = vld [vmem:[%s1464_s1 + $0x8] sm:$0xff]  ;;  %p213_p7 = scmp.lt.s32.totalorder %s1156_s19, 1  ;;  %vm750_vm1 = vcmask 64512  }
  0x32   : > { %v252_v2 = vld [vmem:[%s1464_s1 + $0x10] sm:$0xff]  ;;  %v990_v3 = vpack.c.bf16 %v251_v1, %v250_v0  ;;  %v253_v4 = vld [vmem:[%s1464_s1 + $0x18] sm:$0xff]  ;;  %v218_v5 = vld [vmem:[%s1223_s9] sm:$0xff] }
  0x33   : > { %v234_v6 = vld [vmem:[%s1223_s9 + $0x80] sm:$0xff]  ;;  %v994_v7 = vpack.c.bf16 %v253_v4, %v252_v2  ;;  %942 = vmatprep.mubr.msk.f32.mxu0 %vm254_vm0, %v218_v5  ;;  %v219_v8 = vld [vmem:[%s1223_s9 + $0x8] sm:$0xff]  ;;  %v220_v10 = vld [vmem:[%s1223_s9 + $0x10] sm:$0xff]  ;;  %s1476_s19 = smov (!%p213_p7, %s1156_s19), 1 }
  0x34   : > { %966 = vmatprep.mubr.msk.f32.mxu1 %vm254_vm0, %v234_v6  ;;  %991 = vmatprep.subr.bf16.mxu0 %v990_v3  ;;  %v235_v9 = vld [vmem:[%s1223_s9 + $0x88] sm:$0xff]  ;;  %v236_v11 = vld [vmem:[%s1223_s9 + $0x90] sm:$0xff]  ;;  %v221_v12 = vld [vmem:[%s1223_s9 + $0x18] sm:$0xff]  ;;  %s897_s21 = sshll.u32 %s1476_s19, 8 }
  0x35   : > { %998 = vmatprep.subr.bf16.mxu1 %v990_v3  ;;  %993 = vmatpush3.bf16.msra.mxu0 %v990_v3  ;;  %v237_v13 = vld [vmem:[%s1223_s9 + $0x98] sm:$0xff]  ;;  %v222_v14 = vld [vmem:[%s1223_s9 + $0x20] sm:$0xff]  ;;  %v223_v16 = vld [vmem:[%s1223_s9 + $0x28] sm:$0xff]  ;;  %s1328_s26 = scalar_lea.vmem %s1467_s4, %s897_s21 }
  0x36   : > { %1000 = vmatpush3.bf16.msra.mxu1 %v990_v3  ;;  %995 = vmatprep.subr.bf16.mxu0 %v994_v7  ;;  %v238_v15 = vld [vmem:[%s1223_s9 + $0xa0] sm:$0xff]  ;;  %v239_v17 = vld [vmem:[%s1223_s9 + $0xa8] sm:$0xff]  ;;  %v224_v18 = vld [vmem:[%s1223_s9 + $0x30] sm:$0xff] }
  0x37   : > { %999 = vmatprep.subr.bf16.mxu1 %v994_v7  ;;  %v240_v19 = vld [vmem:[%s1223_s9 + $0xb0] sm:$0xff]  ;;  %v225_v20 = vld [vmem:[%s1223_s9 + $0x38] sm:$0xff]  ;;  %v226_v22 = vld [vmem:[%s1223_s9 + $0x40] sm:$0xff] }
  0x38   : > { %v241_v21 = vld [vmem:[%s1223_s9 + $0xb8] sm:$0xff]  ;;  %v242_v23 = vld [vmem:[%s1223_s9 + $0xc0] sm:$0xff]  ;;  %v227_v24 = vld [vmem:[%s1223_s9 + $0x48] sm:$0xff] }
  0x39   : > { %997 = vmatpush3.bf16.msra.mxu0 %v994_v7  ;;  %v243_v25 = vld [vmem:[%s1223_s9 + $0xc8] sm:$0xff]  ;;  %v228_v26 = vld [vmem:[%s1223_s9 + $0x50] sm:$0xff]  ;;  %v229_v28 = vld [vmem:[%s1223_s9 + $0x58] sm:$0xff] }
  0x3a   : > { %1001 = vmatpush3.bf16.msra.mxu1 %v994_v7  ;;  %v244_v27 = vld [vmem:[%s1223_s9 + $0xd0] sm:$0xff]  ;;  %v245_v29 = vld [vmem:[%s1223_s9 + $0xd8] sm:$0xff]  ;;  %v230_v30 = vld [vmem:[%s1223_s9 + $0x60] sm:$0xff] }
  0x3b   : > { %v246_v31 = vld [vmem:[%s1223_s9 + $0xe0] sm:$0xff]  ;;  %v231_v32 = vld [vmem:[%s1223_s9 + $0x68] sm:$0xff]  ;;  %v232_v34 = vld [vmem:[%s1223_s9 + $0x70] sm:$0xff] }
  0x3c   : > { %943 = vmatmul.mubr.msk.f32.vlgmr.msra.gmra.mrb[0].mxu0 %vm254_vm0, %v219_v8  ;;  %v247_v33 = vld [vmem:[%s1223_s9 + $0xe8] sm:$0xff]  ;;  %v248_v35 = vld [vmem:[%s1223_s9 + $0xf0] sm:$0xff]  ;;  %v233_v36 = vld [vmem:[%s1223_s9 + $0x78] sm:$0xff] }
  0x3d   : > { %967 = vmatmul.mubr.msk.f32.vlgmr.msra.gmra.mrb[0].mxu1 %vm254_vm0, %v235_v9  ;;  %945 = vmatprep.mubr.msk.f32.mxu0 %vm254_vm0, %v220_v10  ;;  %v249_v37 = vld [vmem:[%s1223_s9 + $0xf8] sm:$0xff]  ;;  %v1310_v38 = vld [vmem:[%s1465_s2] ss:$0 sm:$0xff] }
  0x3e   : > { %969 = vmatprep.mubr.msk.f32.mxu1 %vm254_vm0, %v236_v11  ;;  %v1315_v40 = vld [vmem:[%s1466_s3] ss:$0 sm:$0xff] }
  0x40   : > { %946 = vmatmul.mubr.msk.f32.gmra.mrb[2].mxu0 %vm254_vm0, %v221_v12 }
  0x41   : > { %970 = vmatmul.mubr.msk.f32.gmra.mrb[2].mxu1 %vm254_vm0, %v237_v13  ;;  %948 = vmatprep.mubr.msk.f32.mxu0 %vm254_vm0, %v222_v14 }
  0x42   : > { %972 = vmatprep.mubr.msk.f32.mxu1 %vm254_vm0, %v238_v15 }
  0x44   : > { %949 = vmatmul.mubr.msk.f32.gmra.mrb[4].mxu0 %vm254_vm0, %v223_v16 }
  0x45   : > { %973 = vmatmul.mubr.msk.f32.gmra.mrb[4].mxu1 %vm254_vm0, %v239_v17  ;;  %951 = vmatprep.mubr.msk.f32.mxu0 %vm254_vm0, %v224_v18 }
  0x46   : > { %975 = vmatprep.mubr.msk.f32.mxu1 %vm254_vm0, %v240_v19 }
  0x48   : > { %952 = vmatmul.mubr.msk.f32.gmra.mrb[6].mxu0 %vm254_vm0, %v225_v20 }
  0x49   : > { %976 = vmatmul.mubr.msk.f32.gmra.mrb[6].mxu1 %vm254_vm0, %v241_v21  ;;  %954 = vmatprep.mubr.msk.f32.mxu0 %vm254_vm0, %v226_v22 }
  0x4a   : > { %978 = vmatprep.mubr.msk.f32.mxu1 %vm254_vm0, %v242_v23 }
  0x4c   : > { %955 = vmatmul.mubr.msk.f32.gmra.mrb[8].mxu0 %vm254_vm0, %v227_v24 }
  0x4d   : > { %979 = vmatmul.mubr.msk.f32.gmra.mrb[8].mxu1 %vm254_vm0, %v243_v25  ;;  %957 = vmatprep.mubr.msk.f32.mxu0 %vm254_vm0, %v228_v26 }
  0x4e   : > { %981 = vmatprep.mubr.msk.f32.mxu1 %vm254_vm0, %v244_v27 }
  0x50   : > { %958 = vmatmul.mubr.msk.f32.gmra.mrb[10].mxu0 %vm254_vm0, %v229_v28 }
  0x51   : > { %982 = vmatmul.mubr.msk.f32.gmra.mrb[10].mxu1 %vm254_vm0, %v245_v29  ;;  %960 = vmatprep.mubr.msk.f32.mxu0 %vm254_vm0, %v230_v30 }
  0x52   : > { %984 = vmatprep.mubr.msk.f32.mxu1 %vm254_vm0, %v246_v31 }
  0x54   : > { %961 = vmatmul.mubr.msk.f32.gmra.mrb[12].mxu0 %vm254_vm0, %v231_v32 }
  0x55   : > { %985 = vmatmul.mubr.msk.f32.gmra.mrb[12].mxu1 %vm254_vm0, %v247_v33  ;;  %963 = vmatprep.mubr.msk.f32.mxu0 %vm254_vm0, %v232_v34 }
  0x56   : > { %987 = vmatprep.mubr.msk.f32.mxu1 %vm254_vm0, %v248_v35 }
  0x58   : > { %964 = vmatmul.mubr.msk.f32.gmra.mrb[14].mxu0 %vm254_vm0, %v233_v36 }
  0x59   : > { %988 = vmatmul.mubr.msk.f32.gmra.mrb[14].mxu1 %vm254_vm0, %v249_v37 }
 0x10f   : > { %v944_v39 = vpop.f32.mrb[0].mxu0 }
 0x110   : > { %v968_v41 = vpop.f32.mrb[0].mxu1  ;;  %v584_v42 = vmul.f32 %v944_v39, %v1310_v38  ;;  %v417_v44 = vpop.f32.mrb[1].mxu0 }
 0x111   : > { %v600_v43 = vmul.f32 %v968_v41, %v1310_v38  ;;  %v497_v45 = vpop.f32.mrb[1].mxu1  ;;  %v583_v46 = vmul.f32 %v1310_v38, %v417_v44 }
 0x112   : > { %v599_v47 = vmul.f32 %v1310_v38, %v497_v45  ;;  %v623_v48 = vadd.f32 %v1315_v40, %v584_v42 }
 0x113   : > { %v639_v49 = vadd.f32 %v1315_v40, %v600_v43  ;;  %v622_v50 = vadd.f32 %v1315_v40, %v583_v46  ;;  %v947_v52 = vpop.f32.mrb[2].mxu0 }
 0x114   : > { %v638_v51 = vadd.f32 %v1315_v40, %v599_v47  ;;  %v971_v53 = vpop.f32.mrb[2].mxu1  ;;  %vm655_vm2 = vcmp.ge.f32.partialorder %v623_v48, 0.0  ;;  %v687_v54 = vmul.f32 0.001, %v623_v48  ;;  %v586_v60 = vmul.f32 %v947_v52, %v1310_v38  ;;  %v427_v62 = vpop.f32.mrb[3].mxu0 }
 0x115   : > { %vm671_vm3 = vcmp.ge.f32.partialorder %v639_v49, 0.0  ;;  %v703_v55 = vmul.f32 0.001, %v639_v49  ;;  %vm654_vm4 = vcmp.ge.f32.partialorder %v622_v50, 0.0  ;;  %v686_v56 = vmul.f32 0.001, %v622_v50 }
 0x116   : > { %vm670_vm5 = vcmp.ge.f32.partialorder %v638_v51, 0.0  ;;  %v702_v57 = vmul.f32 0.001, %v638_v51  ;;  %v719_v58 = vsel %vm655_vm2, %v623_v48, %v687_v54  ;;  %v602_v61 = vmul.f32 %v971_v53, %v1310_v38  ;;  %v507_v63 = vpop.f32.mrb[3].mxu1 }
 0x117   : > { %v735_v59 = vsel %vm671_vm3, %v639_v49, %v703_v55  ;;  %752 = vst.msk [vmem:[%s1328_s26 + $0x8] sm:$0xff] %vm750_vm1, %v719_v58  ;;  %v718_v0 = vsel %vm654_vm4, %v622_v50, %v686_v56  ;;  %v585_v2 = vmul.f32 %v1310_v38, %v427_v62  ;;  %v601_v3 = vmul.f32 %v1310_v38, %v507_v63  ;;  %v950_v4 = vpop.f32.mrb[4].mxu0 }
 0x118   : > { %768 = vst.msk [vmem:[%s1328_s26 + $0x88] sm:$0xff] %vm750_vm1, %v735_v59  ;;  %v734_v1 = vsel %vm670_vm5, %v638_v51, %v702_v57  ;;  %v974_v5 = vpop.f32.mrb[4].mxu1  ;;  %751 = vst.msk [vmem:[%s1328_s26] sm:$0xff] %vm750_vm1, %v718_v0  ;;  %v625_v6 = vadd.f32 %v1315_v40, %v586_v60  ;;  %v641_v7 = vadd.f32 %v1315_v40, %v602_v61  ;;  %v437_v10 = vpop.f32.mrb[5].mxu0 }
 0x119   : > { %767 = vst.msk [vmem:[%s1328_s26 + $0x80] sm:$0xff] %vm750_vm1, %v734_v1  ;;  %v588_v8 = vmul.f32 %v950_v4, %v1310_v38  ;;  %v604_v9 = vmul.f32 %v974_v5, %v1310_v38  ;;  %v517_v11 = vpop.f32.mrb[5].mxu1  ;;  %v624_v12 = vadd.f32 %v1315_v40, %v585_v2  ;;  %v640_v13 = vadd.f32 %v1315_v40, %v601_v3 }
 0x11a   : > { %v587_v14 = vmul.f32 %v1310_v38, %v437_v10  ;;  %v603_v15 = vmul.f32 %v1310_v38, %v517_v11  ;;  %vm657_vm6 = vcmp.ge.f32.partialorder %v625_v6, 0.0  ;;  %v689_v16 = vmul.f32 0.001, %v625_v6 }
 0x11b   : > { %vm673_vm7 = vcmp.ge.f32.partialorder %v641_v7, 0.0  ;;  %v705_v17 = vmul.f32 0.001, %v641_v7  ;;  %vm656_vm8 = vcmp.ge.f32.partialorder %v624_v12, 0.0  ;;  %v688_v18 = vmul.f32 0.001, %v624_v12 }
 0x11c   : > { %vm672_vm9 = vcmp.ge.f32.partialorder %v640_v13, 0.0  ;;  %v704_v19 = vmul.f32 0.001, %v640_v13  ;;  %v721_v20 = vsel %vm657_vm6, %v625_v6, %v689_v16  ;;  %v627_v22 = vadd.f32 %v1315_v40, %v588_v8  ;;  %v953_v24 = vpop.f32.mrb[6].mxu0  ;;  %v977_v25 = vpop.f32.mrb[6].mxu1 }
 0x11d   : > { %v737_v21 = vsel %vm673_vm7, %v641_v7, %v705_v17  ;;  %v643_v23 = vadd.f32 %v1315_v40, %v604_v9  ;;  %754 = vst.msk [vmem:[%s1328_s26 + $0x18] sm:$0xff] %vm750_vm1, %v721_v20  ;;  %v720_v26 = vsel %vm656_vm8, %v624_v12, %v688_v18  ;;  %v626_v28 = vadd.f32 %v1315_v40, %v587_v14  ;;  %v447_v30 = vpop.f32.mrb[7].mxu0  ;;  %v527_v31 = vpop.f32.mrb[7].mxu1 }
 0x11e   : > { %770 = vst.msk [vmem:[%s1328_s26 + $0x98] sm:$0xff] %vm750_vm1, %v737_v21  ;;  %v736_v27 = vsel %vm672_vm9, %v640_v13, %v704_v19  ;;  %v642_v29 = vadd.f32 %v1315_v40, %v603_v15  ;;  %753 = vst.msk [vmem:[%s1328_s26 + $0x10] sm:$0xff] %vm750_vm1, %v720_v26  ;;  %vm659_vm10 = vcmp.ge.f32.partialorder %v627_v22, 0.0  ;;  %v691_v32 = vmul.f32 0.001, %v627_v22 }
 0x11f   : > { %769 = vst.msk [vmem:[%s1328_s26 + $0x90] sm:$0xff] %vm750_vm1, %v736_v27  ;;  %vm675_vm11 = vcmp.ge.f32.partialorder %v643_v23, 0.0  ;;  %v707_v33 = vmul.f32 0.001, %v643_v23  ;;  %vm658_vm12 = vcmp.ge.f32.partialorder %v626_v28, 0.0  ;;  %v590_v39 = vmul.f32 %v953_v24, %v1310_v38  ;;  %v956_v42 = vpop.f32.mrb[8].mxu0 }
 0x120   : > { %v690_v34 = vmul.f32 0.001, %v626_v28  ;;  %vm674_vm13 = vcmp.ge.f32.partialorder %v642_v29, 0.0  ;;  %v706_v35 = vmul.f32 0.001, %v642_v29  ;;  %v723_v36 = vsel %vm659_vm10, %v627_v22, %v691_v32  ;;  %v980_v43 = vpop.f32.mrb[8].mxu1 }
 0x121   : > { %v739_v37 = vsel %vm675_vm11, %v643_v23, %v707_v33  ;;  %v606_v41 = vmul.f32 %v977_v25, %v1310_v38  ;;  %756 = vst.msk [vmem:[%s1328_s26 + $0x28] sm:$0xff] %vm750_vm1, %v723_v36  ;;  %v589_v46 = vmul.f32 %v1310_v38, %v447_v30  ;;  %v605_v47 = vmul.f32 %v1310_v38, %v527_v31  ;;  %v457_v48 = vpop.f32.mrb[9].mxu0  ;;  %v537_v49 = vpop.f32.mrb[9].mxu1 }
 0x122   : > { %772 = vst.msk [vmem:[%s1328_s26 + $0xa8] sm:$0xff] %vm750_vm1, %v739_v37  ;;  %v722_v44 = vsel %vm658_vm12, %v626_v28, %v690_v34  ;;  %v738_v45 = vsel %vm674_vm13, %v642_v29, %v706_v35  ;;  %v629_v50 = vadd.f32 %v1315_v40, %v590_v39  ;;  %v592_v52 = vmul.f32 %v956_v42, %v1310_v38 }
 0x123   : > { %755 = vst.msk [vmem:[%s1328_s26 + $0x20] sm:$0xff] %vm750_vm1, %v722_v44  ;;  %771 = vst.msk [vmem:[%s1328_s26 + $0xa0] sm:$0xff] %vm750_vm1, %v738_v45  ;;  %v645_v51 = vadd.f32 %v1315_v40, %v606_v41  ;;  %v608_v53 = vmul.f32 %v980_v43, %v1310_v38  ;;  %v628_v54 = vadd.f32 %v1315_v40, %v589_v46  ;;  %v959_v58 = vpop.f32.mrb[10].mxu0 }
 0x124   : > { %v644_v55 = vadd.f32 %v1315_v40, %v605_v47  ;;  %v591_v56 = vmul.f32 %v1310_v38, %v457_v48  ;;  %v607_v57 = vmul.f32 %v1310_v38, %v537_v49  ;;  %v983_v59 = vpop.f32.mrb[10].mxu1  ;;  %vm661_vm14 = vcmp.ge.f32.partialorder %v629_v50, 0.0  ;;  %v467_v4 = vpop.f32.mrb[11].mxu0 }
 0x125   : > { %v693_v60 = vmul.f32 0.001, %v629_v50  ;;  %vm677_vm15 = vcmp.ge.f32.partialorder %v645_v51, 0.0  ;;  %v709_v61 = vmul.f32 0.001, %v645_v51  ;;  %vm660_vm0 = vcmp.ge.f32.partialorder %v628_v54, 0.0 }
 0x126   : > { %v692_v62 = vmul.f32 0.001, %v628_v54  ;;  %vm676_vm2 = vcmp.ge.f32.partialorder %v644_v55, 0.0  ;;  %v708_v63 = vmul.f32 0.001, %v644_v55  ;;  %v631_v2 = vadd.f32 %v1315_v40, %v592_v52  ;;  %v547_v5 = vpop.f32.mrb[11].mxu1 }
 0x127   : > { %v725_v0 = vsel %vm661_vm14, %v629_v50, %v693_v60  ;;  %v741_v1 = vsel %vm677_vm15, %v645_v51, %v709_v61  ;;  %v647_v3 = vadd.f32 %v1315_v40, %v608_v53  ;;  %v630_v8 = vadd.f32 %v1315_v40, %v591_v56  ;;  %v962_v10 = vpop.f32.mrb[12].mxu0 }
 0x128   : > { %758 = vst.msk [vmem:[%s1328_s26 + $0x38] sm:$0xff] %vm750_vm1, %v725_v0  ;;  %774 = vst.msk [vmem:[%s1328_s26 + $0xb8] sm:$0xff] %vm750_vm1, %v741_v1  ;;  %v724_v6 = vsel %vm660_vm0, %v628_v54, %v692_v62  ;;  %v740_v7 = vsel %vm676_vm2, %v644_v55, %v708_v63  ;;  %v646_v9 = vadd.f32 %v1315_v40, %v607_v57  ;;  %v986_v11 = vpop.f32.mrb[12].mxu1  ;;  %vm663_vm3 = vcmp.ge.f32.partialorder %v631_v2, 0.0  ;;  %v477_v20 = vpop.f32.mrb[13].mxu0 }
 0x129   : > { %757 = vst.msk [vmem:[%s1328_s26 + $0x30] sm:$0xff] %vm750_vm1, %v724_v6  ;;  %773 = vst.msk [vmem:[%s1328_s26 + $0xb0] sm:$0xff] %vm750_vm1, %v740_v7  ;;  %v695_v12 = vmul.f32 0.001, %v631_v2  ;;  %vm679_vm4 = vcmp.ge.f32.partialorder %v647_v3, 0.0  ;;  %vm662_vm5 = vcmp.ge.f32.partialorder %v630_v8, 0.0  ;;  %v594_v18 = vmul.f32 %v959_v58, %v1310_v38 }
 0x12a   : > { %v711_v13 = vmul.f32 0.001, %v647_v3  ;;  %v694_v14 = vmul.f32 0.001, %v630_v8  ;;  %vm678_vm6 = vcmp.ge.f32.partialorder %v646_v9, 0.0  ;;  %v610_v19 = vmul.f32 %v983_v59, %v1310_v38  ;;  %v557_v21 = vpop.f32.mrb[13].mxu1 }
 0x12b   : > { %v710_v15 = vmul.f32 0.001, %v646_v9  ;;  %v727_v16 = vsel %vm663_vm3, %v631_v2, %v695_v12  ;;  %v593_v24 = vmul.f32 %v1310_v38, %v467_v4  ;;  %v609_v25 = vmul.f32 %v1310_v38, %v547_v5  ;;  %v965_v26 = vpop.f32.mrb[14].mxu0 }
 0x12c   : > { %v743_v17 = vsel %vm679_vm4, %v647_v3, %v711_v13  ;;  %760 = vst.msk [vmem:[%s1328_s26 + $0x48] sm:$0xff] %vm750_vm1, %v727_v16  ;;  %v726_v22 = vsel %vm662_vm5, %v630_v8, %v694_v14  ;;  %v989_v27 = vpop.f32.mrb[14].mxu1  ;;  %v633_v28 = vadd.f32 %v1315_v40, %v594_v18  ;;  %v649_v29 = vadd.f32 %v1315_v40, %v610_v19  ;;  %v487_v32 = vpop.f32.mrb[15].mxu0 }
 0x12d   : > { %776 = vst.msk [vmem:[%s1328_s26 + $0xc8] sm:$0xff] %vm750_vm1, %v743_v17  ;;  %v742_v23 = vsel %vm678_vm6, %v646_v9, %v710_v15  ;;  %759 = vst.msk [vmem:[%s1328_s26 + $0x40] sm:$0xff] %vm750_vm1, %v726_v22  ;;  %v596_v30 = vmul.f32 %v962_v10, %v1310_v38  ;;  %v612_v31 = vmul.f32 %v986_v11, %v1310_v38  ;;  %v567_v33 = vpop.f32.mrb[15].mxu1 }
 0x12e   : > { %775 = vst.msk [vmem:[%s1328_s26 + $0xc0] sm:$0xff] %vm750_vm1, %v742_v23  ;;  %v632_v34 = vadd.f32 %v1315_v40, %v593_v24  ;;  %v648_v35 = vadd.f32 %v1315_v40, %v609_v25  ;;  %v595_v36 = vmul.f32 %v1310_v38, %v477_v20  ;;  %v611_v37 = vmul.f32 %v1310_v38, %v557_v21 }
 0x12f   : > { %vm665_vm7 = vcmp.ge.f32.partialorder %v633_v28, 0.0  ;;  %v697_v39 = vmul.f32 0.001, %v633_v28  ;;  %vm681_vm8 = vcmp.ge.f32.partialorder %v649_v29, 0.0  ;;  %v713_v41 = vmul.f32 0.001, %v649_v29 }
 0x130   : > { %vm664_vm9 = vcmp.ge.f32.partialorder %v632_v34, 0.0  ;;  %v696_v42 = vmul.f32 0.001, %v632_v34  ;;  %vm680_vm10 = vcmp.ge.f32.partialorder %v648_v35, 0.0  ;;  %v712_v43 = vmul.f32 0.001, %v648_v35 }
 0x131   : > { %v729_v44 = vsel %vm665_vm7, %v633_v28, %v697_v39  ;;  %v745_v45 = vsel %vm681_vm8, %v649_v29, %v713_v41  ;;  %v635_v46 = vadd.f32 %v1315_v40, %v596_v30  ;;  %v651_v47 = vadd.f32 %v1315_v40, %v612_v31 }
 0x132   : > { %762 = vst.msk [vmem:[%s1328_s26 + $0x58] sm:$0xff] %vm750_vm1, %v729_v44  ;;  %778 = vst.msk [vmem:[%s1328_s26 + $0xd8] sm:$0xff] %vm750_vm1, %v745_v45  ;;  %v728_v48 = vsel %vm664_vm9, %v632_v34, %v696_v42  ;;  %v744_v49 = vsel %vm680_vm10, %v648_v35, %v712_v43  ;;  %v634_v50 = vadd.f32 %v1315_v40, %v595_v36 }
 0x133   : > { %v650_v51 = vadd.f32 %v1315_v40, %v611_v37  ;;  %761 = vst.msk [vmem:[%s1328_s26 + $0x50] sm:$0xff] %vm750_vm1, %v728_v48  ;;  %777 = vst.msk [vmem:[%s1328_s26 + $0xd0] sm:$0xff] %vm750_vm1, %v744_v49  ;;  %vm667_vm11 = vcmp.ge.f32.partialorder %v635_v46, 0.0  ;;  %v699_v52 = vmul.f32 0.001, %v635_v46  ;;  %vm683_vm12 = vcmp.ge.f32.partialorder %v651_v47, 0.0 }
 0x134   : > { %v715_v53 = vmul.f32 0.001, %v651_v47  ;;  %vm666_vm13 = vcmp.ge.f32.partialorder %v634_v50, 0.0  ;;  %v698_v54 = vmul.f32 0.001, %v634_v50  ;;  %v598_v58 = vmul.f32 %v965_v26, %v1310_v38 }
 0x135   : > { %vm682_vm14 = vcmp.ge.f32.partialorder %v650_v51, 0.0  ;;  %v714_v55 = vmul.f32 0.001, %v650_v51  ;;  %v731_v56 = vsel %vm667_vm11, %v635_v46, %v699_v52  ;;  %v614_v59 = vmul.f32 %v989_v27, %v1310_v38 }
 0x136   : > { %v747_v57 = vsel %vm683_vm12, %v651_v47, %v715_v53  ;;  %764 = vst.msk [vmem:[%s1328_s26 + $0x68] sm:$0xff] %vm750_vm1, %v731_v56  ;;  %v730_v60 = vsel %vm666_vm13, %v634_v50, %v698_v54  ;;  %v597_v62 = vmul.f32 %v1310_v38, %v487_v32  ;;  %v613_v63 = vmul.f32 %v1310_v38, %v567_v33 }
 0x137   : > { %780 = vst.msk [vmem:[%s1328_s26 + $0xe8] sm:$0xff] %vm750_vm1, %v747_v57  ;;  %v746_v61 = vsel %vm682_vm14, %v650_v51, %v714_v55  ;;  %763 = vst.msk [vmem:[%s1328_s26 + $0x60] sm:$0xff] %vm750_vm1, %v730_v60  ;;  %v637_v0 = vadd.f32 %v1315_v40, %v598_v58  ;;  %v653_v1 = vadd.f32 %v1315_v40, %v614_v59 }
 0x138   : > { %779 = vst.msk [vmem:[%s1328_s26 + $0xe0] sm:$0xff] %vm750_vm1, %v746_v61  ;;  %v636_v2 = vadd.f32 %v1315_v40, %v597_v62  ;;  %v652_v3 = vadd.f32 %v1315_v40, %v613_v63 }
 0x139   : > { %vm669_vm15 = vcmp.ge.f32.partialorder %v637_v0, 0.0  ;;  %v701_v4 = vmul.f32 0.001, %v637_v0  ;;  %vm685_vm0 = vcmp.ge.f32.partialorder %v653_v1, 0.0  ;;  %v717_v38 = vmul.f32 0.001, %v653_v1 }
 0x13a   : > { %vm668_vm2 = vcmp.ge.f32.partialorder %v636_v2, 0.0  ;;  %v700_v5 = vmul.f32 0.001, %v636_v2  ;;  %vm684_vm3 = vcmp.ge.f32.partialorder %v652_v3, 0.0  ;;  %v716_v6 = vmul.f32 0.001, %v652_v3 }
 0x13b   : > { %v733_v7 = vsel %vm669_vm15, %v637_v0, %v701_v4  ;;  %v749_v8 = vsel %vm685_vm0, %v653_v1, %v717_v38 }
 0x13c   : > { %766 = vst.msk [vmem:[%s1328_s26 + $0x78] sm:$0xff] %vm750_vm1, %v733_v7  ;;  %782 = vst.msk [vmem:[%s1328_s26 + $0xf8] sm:$0xff] %vm750_vm1, %v749_v8  ;;  %v732_v9 = vsel %vm668_vm2, %v636_v2, %v700_v5  ;;  %v748_v10 = vsel %vm684_vm3, %v652_v3, %v716_v6 }
 0x13d   : > { %765 = vst.msk [vmem:[%s1328_s26 + $0x70] sm:$0xff] %vm750_vm1, %v732_v9  ;;  %781 = vst.msk [vmem:[%s1328_s26 + $0xf0] sm:$0xff] %vm750_vm1, %v748_v10 }
 0x13e PF: > { %p14_p8 = scmp.ge.s32.totalorder %s1159_s20, 4   ;;  %s1471_s15 = smov %s1099_s16 }
 0x13f   : > { %s1472_s16 = smov %s1103_s17  ;;  %s1473_s17 = smov %s1169_s23 }
 0x140   : > { %s1474_s18 = smov %s1159_s20  ;;  %16 = sbr.rel (!%p14_p8) target bundleno = 3 (0x3), region = 76 }
 0x147   :  { %804 = vsyncpa [#allocation3], 1 }
 0x148   :  { %806 = vsyncpa [#allocation3 + $0x1], 1 }

// kernel: bottleneck_forward.3
= control target key start
LH: loop header
LB: loop body
LE: loop exit
PB: predicated region body
PF: predicated region fallthrough
CT: control target
= control target key end

     0   :  { %17 = vsyncpa [#allocation3], 0  ;;  %s3113_s0 = inlined_call_operand.vmem [shape: f32[2,256,72], index: 0, kind: input, shape index: {}]   ;;  %s3114_s1 = inlined_call_operand.vmem [shape: f32[2,256,32], index: 1, kind: input, shape index: {}]   ;;  %s3115_s2 = inlined_call_operand.vmem [shape: f32[72,8], index: 2, kind: input, shape index: {}]   ;;  %s3116_s3 = inlined_call_operand.vmem [shape: f32[1,8], index: 3, kind: input, shape index: {}]   ;;  %s3117_s4 = inlined_call_operand.vmem [shape: f32[1,8], index: 4, kind: input, shape index: {}]   ;;  %s3118_s5 = inlined_call_operand.vmem [shape: f32[8,64], index: 5, kind: input, shape index: {}]   ;;  %s3119_s6 = inlined_call_operand.vmem [shape: f32[1,64], index: 6, kind: input, shape index: {}]   ;;  %s3120_s7 = inlined_call_operand.vmem [shape: f32[64,8], index: 7, kind: input, shape index: {}]   ;;  %s3121_s8 = inlined_call_operand.vmem [shape: f32[1,8], index: 8, kind: input, shape index: {}]   ;;  %s3122_s9 = inlined_call_operand.vmem [shape: f32[8,32], index: 9, kind: input, shape index: {}]   ;;  %s3123_s10 = inlined_call_operand.vmem [shape: f32[1,32], index: 10, kind: input, shape index: {}]   ;;  %s3124_s11 = inlined_call_operand.vmem [shape: f32[1,32], index: 11, kind: input, shape index: {}]   ;;  %s3125_s12 = inlined_call_operand.hbm [shape: f32[2,256,32], index: 12, kind: output, shape index: {}]  }
   0x1   :  { %19 = vsyncpa [#allocation3 + $0x1], 0  ;;  %s2382_s21 = smov 0   ;;  %s2384_s22 = smov 0  }
   0x2   :  { %s2386_s23 = smov 0   ;;  %s2388_s24 = smov 0  }
   0x3 LB: > { %s2403_s25 = sadd.s32 4294967295, %s2309_s24   ;;  %s1859_s26 = sadd.s32 4294967294, %s2309_s24   ;;  %s2309_s24 = sphi %s2388_s24, %s3133_s24   ;;  %s2305_s23 = sphi %s2386_s23, %s3132_s23   ;;  %s2301_s22 = sphi %s2384_s22, %s3131_s22   ;;  %s2297_s21 = sphi %s2382_s21, %s3130_s21  }
   0x4   : > { %s2407_s27 = sadd.s32 1, %s2309_s24   ;;  %s294_s28 = sadd.s32 1, %s2305_s23 }
   0x5   : > { %s291_s29 = ssub.s32 %s2309_s24, %s2407_s27  ;;  %p304_p0 = scmp.ne.s32.totalorder %s2305_s23, %s2301_s22 }
   0x6   : > { %p292_p1 = scmp.eq.s32.totalorder %s291_s29, 0  ;;  %p305_p2 = scmp.eq.s32.totalorder %s2403_s25, 1 }
   0x7   : > { %p310_p3 = scmp.ne.s32.totalorder %s2301_s22, %s2297_s21  ;;  %p311_p4 = scmp.eq.s32.totalorder %s1859_s26, 1 }
   0x8   : > { %s2418_s30 = scalar_select %p292_p1, %s2305_s23, %s294_s28  }
   0x9   : > { %p2420_p5 = por %p305_p2, %p304_p0  ;;  %p2424_p6 = por %p311_p4, %p310_p3 }
   0xa   : > { %3126 = sst [smem:[#allocation5_spill]] %s2418_s30  ;;  %p1862_p7 = scmp.ge.s32.totalorder %s2309_s24, 1 }
   0xb   : > { %p375_p8 = scmp.lt.s32.totalorder %s2309_s24, 3 }
   0xd   : > { %p376_p9 = pnand %p1862_p7, %p375_p8 }
   0xe   : > { %v464_v0 = vld [vmem:[%s3115_s2] sm:$0xff] (!%p376_p9)  ;;  %v465_v1 = vld [vmem:[%s3115_s2 + $0x8] sm:$0xff] (!%p376_p9)  ;;  %v466_v2 = vld [vmem:[%s3115_s2 + $0x10] sm:$0xff] (!%p376_p9)  ;;  %p422_p10 = scmp.lt.s32.totalorder (!%p376_p9), %s2403_s25, 1  ;;  %vm473_vm0 = vcmask (!%p376_p9), 588800   ;;  %v2311_v46 = vmov (!%p376_p9), 0.0  }
   0xf   : > { %379 = sbr.rel (%p376_p9) target bundleno = 1093 (0x445), region = 68  ;;  %v2171_v3 = vpack.c.bf16 (!%p376_p9), %v465_v1, %v464_v0  ;;  %v467_v4 = vld [vmem:[%s3115_s2 + $0x18] sm:$0xff] (!%p376_p9)  ;;  %v468_v6 = vld [vmem:[%s3115_s2 + $0x20] sm:$0xff] (!%p376_p9)  ;;  %v469_v7 = vld [vmem:[%s3115_s2 + $0x28] sm:$0xff] (!%p376_p9)  ;;  %2097 = vmatprep.subr.mxu1 (!%p376_p9), %v2311_v46  ;;  %vm2312_vm1 = vmmov (!%p376_p9), 0   ;;  %v2313_v47 = vmov (!%p376_p9), 0.0|0.0  }
  0x10   : > { %v2175_v5 = vpack.c.bf16 (!%p376_p9), %v467_v4, %v466_v2  ;;  %v2179_v8 = vpack.c.bf16 (!%p376_p9), %v469_v7, %v468_v6  ;;  %v470_v9 = vld [vmem:[%s3115_s2 + $0x30] sm:$0xff] (!%p376_p9)  ;;  %v471_v10 = vld [vmem:[%s3115_s2 + $0x38] sm:$0xff] (!%p376_p9)  ;;  %v472_v13 = vld [vmem:[%s3115_s2 + $0x40] sm:$0xff] (!%p376_p9)  ;;  %2099 = vmatprep.mubr.msk.f32.mxu1 (!%p376_p9), %vm2312_vm1, %v2311_v46  ;;  %vm969_vm3 = vcmask (!%p376_p9), 64512   ;;  %s419_s28 = sand.u32 (!%p376_p9), 1, %s2301_s22   ;;  %s2314_s30 = smov (!%p376_p9), [#allocation2]  }
  0x11   : > { %2172 = vmatprep.subr.bf16.mxu0 (!%p376_p9), %v2171_v3  ;;  %v2183_v12 = vpack.c.bf16 (!%p376_p9), %v471_v10, %v470_v9  ;;  %v1041_v45 = vld [vmem:[%s3118_s5] sm:$0xff] (!%p376_p9) }
  0x12   : > { %2174 = vmatpush3.bf16.msra.mxu0 (!%p376_p9), %v2171_v3  ;;  %2098 = vmatpush3.msra.mxu1 (!%p376_p9), %v1041_v45  ;;  %v2543_v48 = vld [vmem:[%s3116_s3] ss:$0 sm:$0xff] (!%p376_p9) }
  0x13   : > { %2176 = vmatprep.subr.bf16.mxu0 (!%p376_p9), %v2175_v5  ;;  %2187 = vmatprep.subr.bf16.mxu1 (!%p376_p9), %v2313_v47  ;;  %v2548_v50 = vld [vmem:[%s3117_s4] ss:$0 sm:$0xff] (!%p376_p9) }
  0x16   : > { %s2450_s17 = scalar_select %p422_p10, %s2403_s25, 1  ;;  %2178 = vmatpush3.bf16.msra.mxu0 %v2175_v5 }
  0x17   : > { %2180 = vmatprep.subr.bf16.mxu0 %v2179_v8 }
  0x18   : > { %s1943_s18 = sshll.u32 %s2450_s17, 8  ;;  %s1863_s17 = sshll.u32 %s419_s28, 8 }
  0x19   : > { %s2458_s26 = scalar_lea.vmem %s3113_s0, %s1943_s18  ;;  %s2889_s20 = scalar_lea.vmem %s3114_s1, %s1943_s18 }
  0x1a   : > { %v432_v11 = vld [vmem:[%s2458_s26] sm:$0xff]  ;;  %2182 = vmatpush3.bf16.msra.mxu0 %v2179_v8  ;;  %v433_v14 = vld [vmem:[%s2458_s26 + $0x8] sm:$0xff]  ;;  %v434_v15 = vld [vmem:[%s2458_s26 + $0x10] sm:$0xff]  ;;  %s2911_s18 = scalar_lea.vmem [#allocation2], %s1863_s17  ;;  %s2251_s17 = sshll.u32 %s2314_s30, 4  ;;  %s2252_s17 = int_to_ptr.vmem [resolvable:$false] %s2251_s17 }
  0x1b   : > { %2049 = vmatprep.mubr.msk.f32.mxu0 %vm473_vm0, %v432_v11  ;;  %2184 = vmatprep.subr.bf16.mxu0 %v2183_v12  ;;  %v435_v16 = vld [vmem:[%s2458_s26 + $0x18] sm:$0xff]  ;;  %v436_v17 = vld [vmem:[%s2458_s26 + $0x20] sm:$0xff]  ;;  %v437_v18 = vld [vmem:[%s2458_s26 + $0x28] sm:$0xff]  ;;  %s1785_s15 = sshll.u32 %s2911_s18, 4  ;;  %s3064_s15 = int_to_ptr.vmem [resolvable:$true] %s1785_s15 }
  0x1c   : > { %v438_v19 = vld [vmem:[%s2458_s26 + $0x30] sm:$0xff]  ;;  %v439_v20 = vld [vmem:[%s2458_s26 + $0x38] sm:$0xff]  ;;  %v440_v21 = vld [vmem:[%s2458_s26 + $0x40] sm:$0xff]  ;;  %p2254_p0 = scmp.lt.s32.totalorder %s3064_s15, %s2252_s17 }
  0x1d   : > { %v441_v22 = vld [vmem:[%s2458_s26 + $0x48] sm:$0xff]  ;;  %v442_v23 = vld [vmem:[%s2458_s26 + $0x50] sm:$0xff]  ;;  %v443_v24 = vld [vmem:[%s2458_s26 + $0x58] sm:$0xff] }
  0x1e   : > { %2186 = vmatpush3.bf16.msra.mxu0 %v2183_v12  ;;  %v444_v25 = vld [vmem:[%s2458_s26 + $0x60] sm:$0xff]  ;;  %v445_v26 = vld [vmem:[%s2458_s26 + $0x68] sm:$0xff]  ;;  %v446_v27 = vld [vmem:[%s2458_s26 + $0x70] sm:$0xff] }
  0x1f   : > { %2047 = vmatprep.subr.mxu0 %v472_v13  ;;  %v447_v28 = vld [vmem:[%s2458_s26 + $0x78] sm:$0xff]  ;;  %v448_v29 = vld [vmem:[%s2458_s26 + $0x80] sm:$0xff]  ;;  %v449_v30 = vld [vmem:[%s2458_s26 + $0x88] sm:$0xff] }
  0x20   : > { %v450_v31 = vld [vmem:[%s2458_s26 + $0x90] sm:$0xff]  ;;  %v451_v32 = vld [vmem:[%s2458_s26 + $0x98] sm:$0xff]  ;;  %v452_v33 = vld [vmem:[%s2458_s26 + $0xa0] sm:$0xff] }
  0x21   : > { %v453_v34 = vld [vmem:[%s2458_s26 + $0xa8] sm:$0xff]  ;;  %v454_v35 = vld [vmem:[%s2458_s26 + $0xb0] sm:$0xff]  ;;  %v455_v36 = vld [vmem:[%s2458_s26 + $0xb8] sm:$0xff] }
  0x22   : > { %2048 = vmatpush3.msra.mxu0 %v472_v13  ;;  %v456_v37 = vld [vmem:[%s2458_s26 + $0xc0] sm:$0xff]  ;;  %v457_v38 = vld [vmem:[%s2458_s26 + $0xc8] sm:$0xff]  ;;  %v458_v39 = vld [vmem:[%s2458_s26 + $0xd0] sm:$0xff] }
  0x23   : > { %2050 = vmatmul.mubr.msk.f32.vlgmr.msra.gmra.mrb[0].mxu0 %vm473_vm0, %v433_v14  ;;  %v459_v40 = vld [vmem:[%s2458_s26 + $0xd8] sm:$0xff]  ;;  %v460_v41 = vld [vmem:[%s2458_s26 + $0xe0] sm:$0xff]  ;;  %v461_v42 = vld [vmem:[%s2458_s26 + $0xe8] sm:$0xff] }
  0x24   : > { %2052 = vmatprep.mubr.msk.f32.mxu0 %vm473_vm0, %v434_v15  ;;  %v462_v43 = vld [vmem:[%s2458_s26 + $0xf0] sm:$0xff]  ;;  %v463_v44 = vld [vmem:[%s2458_s26 + $0xf8] sm:$0xff]  ;;  %s1945_s26 = sshll.u32 %s2403_s25, 12  ;;  %s3072_s25 = scalar_lea.sflag [#allocation3], %s419_s28 }
  0x25   : > { %s3062_s29 = scalar_lea.hbm %s3125_s12, %s1945_s26  ;;  %s2253_s26 = scalar_lea.vmem %s2252_s17, 8192 }
  0x27   : > { %2053 = vmatmul.mubr.msk.f32.gmra.mrb[2].mxu0 %vm473_vm0, %v435_v16 }
  0x28   : > { %2055 = vmatprep.mubr.msk.f32.mxu0 %vm473_vm0, %v436_v17 }
  0x2b   : > { %2056 = vmatmul.mubr.msk.f32.gmra.mrb[4].mxu0 %vm473_vm0, %v437_v18 }
  0x2c   : > { %2058 = vmatprep.mubr.msk.f32.mxu0 %vm473_vm0, %v438_v19 }
  0x2f   : > { %2059 = vmatmul.mubr.msk.f32.gmra.mrb[6].mxu0 %vm473_vm0, %v439_v20 }
  0x30   : > { %2061 = vmatprep.mubr.msk.f32.mxu0 %vm473_vm0, %v440_v21 }
  0x33   : > { %2062 = vmatmul.mubr.msk.f32.gmra.mrb[8].mxu0 %vm473_vm0, %v441_v22 }
  0x34   : > { %2064 = vmatprep.mubr.msk.f32.mxu0 %vm473_vm0, %v442_v23 }
  0x37   : > { %2065 = vmatmul.mubr.msk.f32.gmra.mrb[10].mxu0 %vm473_vm0, %v443_v24 }
  0x38   : > { %2067 = vmatprep.mubr.msk.f32.mxu0 %vm473_vm0, %v444_v25 }
  0x3b   : > { %2068 = vmatmul.mubr.msk.f32.gmra.mrb[12].mxu0 %vm473_vm0, %v445_v26 }
  0x3c   : > { %2070 = vmatprep.mubr.msk.f32.mxu0 %vm473_vm0, %v446_v27 }
  0x3f   : > { %2071 = vmatmul.mubr.msk.f32.gmra.mrb[14].mxu0 %vm473_vm0, %v447_v28 }
  0x40   : > { %2073 = vmatprep.mubr.msk.f32.mxu0 %vm473_vm0, %v448_v29 }
  0x43   : > { %2074 = vmatmul.mubr.msk.f32.gmra.mrb[16].mxu0 %vm473_vm0, %v449_v30 }
  0x44   : > { %2076 = vmatprep.mubr.msk.f32.mxu0 %vm473_vm0, %v450_v31 }
  0x47   : > { %2077 = vmatmul.mubr.msk.f32.gmra.mrb[18].mxu0 %vm473_vm0, %v451_v32 }
  0x48   : > { %2079 = vmatprep.mubr.msk.f32.mxu0 %vm473_vm0, %v452_v33 }
  0x4b   : > { %2080 = vmatmul.mubr.msk.f32.gmra.mrb[20].mxu0 %vm473_vm0, %v453_v34 }
  0x4c   : > { %2082 = vmatprep.mubr.msk.f32.mxu0 %vm473_vm0, %v454_v35 }
  0x4f   : > { %2083 = vmatmul.mubr.msk.f32.gmra.mrb[22].mxu0 %vm473_vm0, %v455_v36 }
  0x50   : > { %2085 = vmatprep.mubr.msk.f32.mxu0 %vm473_vm0, %v456_v37 }
  0x53   : > { %2086 = vmatmul.mubr.msk.f32.gmra.mrb[24].mxu0 %vm473_vm0, %v457_v38 }
  0x54   : > { %2088 = vmatprep.mubr.msk.f32.mxu0 %vm473_vm0, %v458_v39 }
  0x57   : > { %2089 = vmatmul.mubr.msk.f32.gmra.mrb[26].mxu0 %vm473_vm0, %v459_v40 }
  0x58   : > { %2091 = vmatprep.mubr.msk.f32.mxu0 %vm473_vm0, %v460_v41 }
  0x5b   : > { %2092 = vmatmul.mubr.msk.f32.gmra.mrb[28].mxu0 %vm473_vm0, %v461_v42 }
  0x5c   : > { %2094 = vmatprep.mubr.msk.f32.mxu0 %vm473_vm0, %v462_v43 }
  0x5f   : > { %2095 = vmatmul.mubr.msk.f32.gmra.mrb[30].mxu0 %vm473_vm0, %v463_v44 }
  0xf6   : > { %v2051_v49 = vpop.f32.mrb[0].mxu0 }
  0xf7   : > { %v803_v51 = vmul.f32 %v2051_v49, %v2543_v48  ;;  %v636_v52 = vpop.f32.mrb[1].mxu0 }
  0xf8   : > { %v802_v53 = vmul.f32 %v2543_v48, %v636_v52 }
  0xf9   : > { %v842_v54 = vadd.f32 %v2548_v50, %v803_v51 }
  0xfa   : > { %v841_v55 = vadd.f32 %v2548_v50, %v802_v53  ;;  %v2054_v56 = vpop.f32.mrb[2].mxu0 }
  0xfb   : > { %vm874_vm2 = vcmp.ge.f32.partialorder %v842_v54, 0.0  ;;  %v906_v57 = vmul.f32 0.001, %v842_v54  ;;  %v805_v58 = vmul.f32 %v2054_v56, %v2543_v48  ;;  %v646_v59 = vpop.f32.mrb[3].mxu0 }
  0xfc   : > { %vm873_vm4 = vcmp.ge.f32.partialorder %v841_v55, 0.0  ;;  %v905_v60 = vmul.f32 0.001, %v841_v55  ;;  %v804_v61 = vmul.f32 %v2543_v48, %v646_v59 }
  0xfd   : > { %v2556_v62 = vsel %vm874_vm2, %v842_v54, %v906_v57  ;;  %v844_v63 = vadd.f32 %v2548_v50, %v805_v58 }
  0xfe   : > { %v971_v0 = vsel %vm969_vm3, %v2556_v62, 0.0  ;;  %v2561_v1 = vsel %vm873_vm4, %v841_v55, %v905_v60  ;;  %v843_v2 = vadd.f32 %v2548_v50, %v804_v61  ;;  %v2057_v3 = vpop.f32.mrb[4].mxu0 }
  0xff   : > { %v970_v4 = vsel %vm969_vm3, %v2561_v1, 0.0  ;;  %vm876_vm5 = vcmp.ge.f32.partialorder %v844_v63, 0.0  ;;  %v908_v5 = vmul.f32 0.001, %v844_v63  ;;  %v807_v6 = vmul.f32 %v2057_v3, %v2543_v48  ;;  %v656_v7 = vpop.f32.mrb[5].mxu0 }
 0x100   : > { %vm875_vm6 = vcmp.ge.f32.partialorder %v843_v2, 0.0  ;;  %v907_v8 = vmul.f32 0.001, %v843_v2  ;;  %v806_v9 = vmul.f32 %v2543_v48, %v656_v7  ;;  %v972_v11 = vadd.f32 %v971_v0, %v970_v4 }
 0x101   : > { %v846_v10 = vadd.f32 %v2548_v50, %v807_v6  ;;  %v2569_v12 = vsel %vm876_vm5, %v844_v63, %v908_v5 }
 0x102   : > { %v2571_v13 = vsel %vm875_vm6, %v843_v2, %v907_v8  ;;  %v845_v14 = vadd.f32 %v2548_v50, %v806_v9  ;;  %v2060_v15 = vpop.f32.mrb[6].mxu0  ;;  %v975_v23 = vsel %vm969_vm3, %v2569_v12, 0.0 }
 0x103   : > { %v973_v16 = vsel %vm969_vm3, %v2571_v13, 0.0  ;;  %vm878_vm7 = vcmp.ge.f32.partialorder %v846_v10, 0.0  ;;  %v910_v17 = vmul.f32 0.001, %v846_v10  ;;  %v809_v18 = vmul.f32 %v2060_v15, %v2543_v48  ;;  %v666_v19 = vpop.f32.mrb[7].mxu0 }
 0x104   : > { %v974_v20 = vadd.f32 %v973_v16, %v972_v11  ;;  %vm877_vm8 = vcmp.ge.f32.partialorder %v845_v14, 0.0  ;;  %v909_v21 = vmul.f32 0.001, %v845_v14  ;;  %v808_v22 = vmul.f32 %v2543_v48, %v666_v19 }
 0x105   : > { %v848_v24 = vadd.f32 %v2548_v50, %v809_v18  ;;  %v2581_v25 = vsel %vm878_vm7, %v846_v10, %v910_v17 }
 0x106   : > { %v2583_v26 = vsel %vm877_vm8, %v845_v14, %v909_v21  ;;  %v976_v27 = vadd.f32 %v975_v23, %v974_v20  ;;  %v847_v28 = vadd.f32 %v2548_v50, %v808_v22  ;;  %v2063_v29 = vpop.f32.mrb[8].mxu0  ;;  %v979_v37 = vsel %vm969_vm3, %v2581_v25, 0.0 }
 0x107   : > { %v977_v30 = vsel %vm969_vm3, %v2583_v26, 0.0  ;;  %vm880_vm9 = vcmp.ge.f32.partialorder %v848_v24, 0.0  ;;  %v912_v31 = vmul.f32 0.001, %v848_v24  ;;  %v811_v32 = vmul.f32 %v2063_v29, %v2543_v48  ;;  %v676_v33 = vpop.f32.mrb[9].mxu0 }
 0x108   : > { %v978_v34 = vadd.f32 %v977_v30, %v976_v27  ;;  %vm879_vm10 = vcmp.ge.f32.partialorder %v847_v28, 0.0  ;;  %v911_v35 = vmul.f32 0.001, %v847_v28  ;;  %v810_v36 = vmul.f32 %v2543_v48, %v676_v33 }
 0x109   : > { %v850_v38 = vadd.f32 %v2548_v50, %v811_v32  ;;  %v2593_v39 = vsel %vm880_vm9, %v848_v24, %v912_v31 }
 0x10a   : > { %v2595_v40 = vsel %vm879_vm10, %v847_v28, %v911_v35  ;;  %v980_v41 = vadd.f32 %v979_v37, %v978_v34  ;;  %v849_v42 = vadd.f32 %v2548_v50, %v810_v36  ;;  %v2066_v43 = vpop.f32.mrb[10].mxu0  ;;  %v983_v55 = vsel %vm969_vm3, %v2593_v39, 0.0 }
 0x10b   : > { %v981_v44 = vsel %vm969_vm3, %v2595_v40, 0.0  ;;  %vm882_vm11 = vcmp.ge.f32.partialorder %v850_v38, 0.0  ;;  %v914_v45 = vmul.f32 0.001, %v850_v38  ;;  %v813_v49 = vmul.f32 %v2066_v43, %v2543_v48  ;;  %v686_v51 = vpop.f32.mrb[11].mxu0 }
 0x10c   : > { %v982_v52 = vadd.f32 %v981_v44, %v980_v41  ;;  %vm881_vm12 = vcmp.ge.f32.partialorder %v849_v42, 0.0  ;;  %v913_v53 = vmul.f32 0.001, %v849_v42  ;;  %v812_v54 = vmul.f32 %v2543_v48, %v686_v51 }
 0x10d   : > { %v852_v56 = vadd.f32 %v2548_v50, %v813_v49  ;;  %v2605_v57 = vsel %vm882_vm11, %v850_v38, %v914_v45 }
 0x10e   : > { %v2607_v58 = vsel %vm881_vm12, %v849_v42, %v913_v53  ;;  %v984_v59 = vadd.f32 %v983_v55, %v982_v52  ;;  %v851_v60 = vadd.f32 %v2548_v50, %v812_v54  ;;  %v2069_v61 = vpop.f32.mrb[12].mxu0  ;;  %v987_v7 = vsel %vm969_vm3, %v2605_v57, 0.0 }
 0x10f   : > { %v985_v63 = vsel %vm969_vm3, %v2607_v58, 0.0  ;;  %vm884_vm13 = vcmp.ge.f32.partialorder %v852_v56, 0.0  ;;  %v916_v0 = vmul.f32 0.001, %v852_v56  ;;  %v815_v2 = vmul.f32 %v2069_v61, %v2543_v48  ;;  %v696_v3 = vpop.f32.mrb[13].mxu0 }
 0x110   : > { %v986_v4 = vadd.f32 %v985_v63, %v984_v59  ;;  %vm883_vm14 = vcmp.ge.f32.partialorder %v851_v60, 0.0  ;;  %v915_v5 = vmul.f32 0.001, %v851_v60  ;;  %v814_v6 = vmul.f32 %v2543_v48, %v696_v3 }
 0x111   : > { %v854_v8 = vadd.f32 %v2548_v50, %v815_v2  ;;  %v2617_v9 = vsel %vm884_vm13, %v852_v56, %v916_v0 }
 0x112   : > { %v2619_v10 = vsel %vm883_vm14, %v851_v60, %v915_v5  ;;  %v988_v11 = vadd.f32 %v987_v7, %v986_v4  ;;  %v853_v14 = vadd.f32 %v2548_v50, %v814_v6  ;;  %v2072_v15 = vpop.f32.mrb[14].mxu0  ;;  %v991_v23 = vsel %vm969_vm3, %v2617_v9, 0.0 }
 0x113   : > { %v989_v16 = vsel %vm969_vm3, %v2619_v10, 0.0  ;;  %vm886_vm15 = vcmp.ge.f32.partialorder %v854_v8, 0.0  ;;  %v918_v17 = vmul.f32 0.001, %v854_v8  ;;  %v817_v18 = vmul.f32 %v2072_v15, %v2543_v48  ;;  %v706_v19 = vpop.f32.mrb[15].mxu0 }
 0x114   : > { %v990_v20 = vadd.f32 %v989_v16, %v988_v11  ;;  %vm885_vm0 = vcmp.ge.f32.partialorder %v853_v14, 0.0  ;;  %v917_v21 = vmul.f32 0.001, %v853_v14  ;;  %v816_v22 = vmul.f32 %v2543_v48, %v706_v19 }
 0x115   : > { %v856_v24 = vadd.f32 %v2548_v50, %v817_v18  ;;  %v2629_v27 = vsel %vm886_vm15, %v854_v8, %v918_v17 }
 0x116   : > { %v2631_v28 = vsel %vm885_vm0, %v853_v14, %v917_v21  ;;  %v992_v29 = vadd.f32 %v991_v23, %v990_v20  ;;  %v855_v30 = vadd.f32 %v2548_v50, %v816_v22  ;;  %v2075_v31 = vpop.f32.mrb[16].mxu0  ;;  %v995_v41 = vsel %vm969_vm3, %v2629_v27, 0.0 }
 0x117   : > { %v993_v32 = vsel %vm969_vm3, %v2631_v28, 0.0  ;;  %vm888_vm2 = vcmp.ge.f32.partialorder %v856_v24, 0.0  ;;  %v920_v33 = vmul.f32 0.001, %v856_v24  ;;  %v819_v34 = vmul.f32 %v2075_v31, %v2543_v48  ;;  %v716_v35 = vpop.f32.mrb[17].mxu0 }
 0x118   : > { %v994_v36 = vadd.f32 %v993_v32, %v992_v29  ;;  %vm887_vm4 = vcmp.ge.f32.partialorder %v855_v30, 0.0  ;;  %v919_v37 = vmul.f32 0.001, %v855_v30  ;;  %v818_v38 = vmul.f32 %v2543_v48, %v716_v35 }
 0x119   : > { %v858_v42 = vadd.f32 %v2548_v50, %v819_v34  ;;  %v2641_v43 = vsel %vm888_vm2, %v856_v24, %v920_v33 }
 0x11a   : > { %v2643_v44 = vsel %vm887_vm4, %v855_v30, %v919_v37  ;;  %v996_v45 = vadd.f32 %v995_v41, %v994_v36  ;;  %v857_v49 = vadd.f32 %v2548_v50, %v818_v38  ;;  %v2078_v51 = vpop.f32.mrb[18].mxu0  ;;  %v999_v61 = vsel %vm969_vm3, %v2641_v43, 0.0 }
 0x11b   : > { %v997_v52 = vsel %vm969_vm3, %v2643_v44, 0.0  ;;  %vm890_vm5 = vcmp.ge.f32.partialorder %v858_v42, 0.0  ;;  %v922_v53 = vmul.f32 0.001, %v858_v42  ;;  %v821_v54 = vmul.f32 %v2078_v51, %v2543_v48  ;;  %v726_v55 = vpop.f32.mrb[19].mxu0 }
 0x11c   : > { %v998_v56 = vadd.f32 %v997_v52, %v996_v45  ;;  %vm889_vm6 = vcmp.ge.f32.partialorder %v857_v49, 0.0  ;;  %v921_v59 = vmul.f32 0.001, %v857_v49  ;;  %v820_v60 = vmul.f32 %v2543_v48, %v726_v55 }
 0x11d   : > { %v860_v63 = vadd.f32 %v2548_v50, %v821_v54  ;;  %v2653_v0 = vsel %vm890_vm5, %v858_v42, %v922_v53 }
 0x11e   : > { %v2655_v2 = vsel %vm889_vm6, %v857_v49, %v921_v59  ;;  %v1000_v3 = vadd.f32 %v999_v61, %v998_v56  ;;  %v859_v4 = vadd.f32 %v2548_v50, %v820_v60  ;;  %v2081_v5 = vpop.f32.mrb[20].mxu0  ;;  %v1003_v17 = vsel %vm969_vm3, %v2653_v0, 0.0 }
 0x11f   : > { %v1001_v6 = vsel %vm969_vm3, %v2655_v2, 0.0  ;;  %vm892_vm7 = vcmp.ge.f32.partialorder %v860_v63, 0.0  ;;  %v924_v7 = vmul.f32 0.001, %v860_v63  ;;  %v823_v8 = vmul.f32 %v2081_v5, %v2543_v48  ;;  %v736_v11 = vpop.f32.mrb[21].mxu0 }
 0x120   : > { %v1002_v14 = vadd.f32 %v1001_v6, %v1000_v3  ;;  %vm891_vm8 = vcmp.ge.f32.partialorder %v859_v4, 0.0  ;;  %v923_v15 = vmul.f32 0.001, %v859_v4  ;;  %v822_v16 = vmul.f32 %v2543_v48, %v736_v11 }
 0x121   : > { %v862_v18 = vadd.f32 %v2548_v50, %v823_v8  ;;  %v2665_v19 = vsel %vm892_vm7, %v860_v63, %v924_v7 }
 0x122   : > { %v2667_v20 = vsel %vm891_vm8, %v859_v4, %v923_v15  ;;  %v1004_v21 = vadd.f32 %v1003_v17, %v1002_v14  ;;  %v861_v22 = vadd.f32 %v2548_v50, %v822_v16  ;;  %v2084_v23 = vpop.f32.mrb[22].mxu0  ;;  %v1007_v35 = vsel %vm969_vm3, %v2665_v19, 0.0 }
 0x123   : > { %v1005_v24 = vsel %vm969_vm3, %v2667_v20, 0.0  ;;  %vm894_vm9 = vcmp.ge.f32.partialorder %v862_v18, 0.0  ;;  %v926_v29 = vmul.f32 0.001, %v862_v18  ;;  %v825_v30 = vmul.f32 %v2084_v23, %v2543_v48  ;;  %v746_v31 = vpop.f32.mrb[23].mxu0 }
 0x124   : > { %v1006_v32 = vadd.f32 %v1005_v24, %v1004_v21  ;;  %vm893_vm10 = vcmp.ge.f32.partialorder %v861_v22, 0.0  ;;  %v925_v33 = vmul.f32 0.001, %v861_v22  ;;  %v824_v34 = vmul.f32 %v2543_v48, %v746_v31 }
 0x125   : > { %v864_v36 = vadd.f32 %v2548_v50, %v825_v30  ;;  %v2677_v37 = vsel %vm894_vm9, %v862_v18, %v926_v29 }
 0x126   : > { %v2679_v38 = vsel %vm893_vm10, %v861_v22, %v925_v33  ;;  %v1008_v41 = vadd.f32 %v1007_v35, %v1006_v32  ;;  %v863_v42 = vadd.f32 %v2548_v50, %v824_v34  ;;  %v2087_v45 = vpop.f32.mrb[24].mxu0  ;;  %v1011_v59 = vsel %vm969_vm3, %v2677_v37, 0.0 }
 0x127   : > { %v1009_v49 = vsel %vm969_vm3, %v2679_v38, 0.0  ;;  %vm896_vm11 = vcmp.ge.f32.partialorder %v864_v36, 0.0  ;;  %v928_v51 = vmul.f32 0.001, %v864_v36  ;;  %v827_v52 = vmul.f32 %v2087_v45, %v2543_v48  ;;  %v756_v53 = vpop.f32.mrb[25].mxu0 }
 0x128   : > { %v1010_v54 = vadd.f32 %v1009_v49, %v1008_v41  ;;  %vm895_vm12 = vcmp.ge.f32.partialorder %v863_v42, 0.0  ;;  %v927_v55 = vmul.f32 0.001, %v863_v42  ;;  %v826_v56 = vmul.f32 %v2543_v48, %v756_v53 }
 0x129   : > { %v866_v60 = vadd.f32 %v2548_v50, %v827_v52  ;;  %v2689_v61 = vsel %vm896_vm11, %v864_v36, %v928_v51 }
 0x12a   : > { %v2691_v63 = vsel %vm895_vm12, %v863_v42, %v927_v55  ;;  %v1012_v3 = vadd.f32 %v1011_v59, %v1010_v54  ;;  %v865_v4 = vadd.f32 %v2548_v50, %v826_v56  ;;  %v2090_v5 = vpop.f32.mrb[26].mxu0  ;;  %v1015_v17 = vsel %vm969_vm3, %v2689_v61, 0.0 }
 0x12b   : > { %v1013_v6 = vsel %vm969_vm3, %v2691_v63, 0.0  ;;  %vm898_vm13 = vcmp.ge.f32.partialorder %v866_v60, 0.0  ;;  %v930_v7 = vmul.f32 0.001, %v866_v60  ;;  %v829_v8 = vmul.f32 %v2090_v5, %v2543_v48  ;;  %v766_v11 = vpop.f32.mrb[27].mxu0 }
 0x12c   : > { %v1014_v14 = vadd.f32 %v1013_v6, %v1012_v3  ;;  %vm897_vm14 = vcmp.ge.f32.partialorder %v865_v4, 0.0  ;;  %v929_v15 = vmul.f32 0.001, %v865_v4  ;;  %v828_v16 = vmul.f32 %v2543_v48, %v766_v11 }
 0x12d   : > { %v868_v18 = vadd.f32 %v2548_v50, %v829_v8  ;;  %v2701_v21 = vsel %vm898_vm13, %v866_v60, %v930_v7 }
 0x12e   : > { %v2703_v22 = vsel %vm897_vm14, %v865_v4, %v929_v15  ;;  %v1016_v23 = vadd.f32 %v1015_v17, %v1014_v14  ;;  %v867_v24 = vadd.f32 %v2548_v50, %v828_v16  ;;  %v2093_v29 = vpop.f32.mrb[28].mxu0  ;;  %v1019_v41 = vsel %vm969_vm3, %v2701_v21, 0.0 }
 0x12f   : > { %v1017_v30 = vsel %vm969_vm3, %v2703_v22, 0.0  ;;  %vm900_vm15 = vcmp.ge.f32.partialorder %v868_v18, 0.0  ;;  %v932_v31 = vmul.f32 0.001, %v868_v18  ;;  %v831_v32 = vmul.f32 %v2093_v29, %v2543_v48  ;;  %v776_v33 = vpop.f32.mrb[29].mxu0 }
 0x130   : > { %v1018_v34 = vadd.f32 %v1017_v30, %v1016_v23  ;;  %vm899_vm0 = vcmp.ge.f32.partialorder %v867_v24, 0.0  ;;  %v931_v35 = vmul.f32 0.001, %v867_v24  ;;  %v830_v36 = vmul.f32 %v2543_v48, %v776_v33 }
 0x131   : > { %v870_v42 = vadd.f32 %v2548_v50, %v831_v32  ;;  %v2713_v45 = vsel %vm900_vm15, %v868_v18, %v932_v31 }
 0x132   : > { %v2715_v49 = vsel %vm899_vm0, %v867_v24, %v931_v35  ;;  %v1020_v51 = vadd.f32 %v1019_v41, %v1018_v34  ;;  %v869_v52 = vadd.f32 %v2548_v50, %v830_v36  ;;  %v2096_v53 = vpop.f32.mrb[30].mxu0  ;;  %v1023_v5 = vsel %vm969_vm3, %v2713_v45, 0.0 }
 0x133   : > { %v1021_v54 = vsel %vm969_vm3, %v2715_v49, 0.0  ;;  %vm902_vm2 = vcmp.ge.f32.partialorder %v870_v42, 0.0  ;;  %v934_v55 = vmul.f32 0.001, %v870_v42  ;;  %v833_v56 = vmul.f32 %v2096_v53, %v2543_v48  ;;  %v786_v59 = vpop.f32.mrb[31].mxu0 }
 0x134   : > { %v1022_v60 = vadd.f32 %v1021_v54, %v1020_v51  ;;  %vm901_vm4 = vcmp.ge.f32.partialorder %v869_v52, 0.0  ;;  %v933_v3 = vmul.f32 0.001, %v869_v52  ;;  %v832_v4 = vmul.f32 %v2543_v48, %v786_v59  ;;  %v1118_v51 = vld [vmem:[%s3120_s7 + $0x8] sm:$0xff] }
 0x135   : > { %v872_v6 = vadd.f32 %v2548_v50, %v833_v56  ;;  %v2725_v7 = vsel %vm902_vm2, %v870_v42, %v934_v55  ;;  %v1117_v42 = vld [vmem:[%s3120_s7] sm:$0xff]  ;;  %v1119_v55 = vld [vmem:[%s3120_s7 + $0x10] sm:$0xff]  ;;  %v1120_v56 = vld [vmem:[%s3120_s7 + $0x18] sm:$0xff] }
 0x136   : > { %v2727_v8 = vsel %vm901_vm4, %v869_v52, %v933_v3  ;;  %v1024_v11 = vadd.f32 %v1023_v5, %v1022_v60  ;;  %v871_v14 = vadd.f32 %v2548_v50, %v832_v4  ;;  %v1027_v18 = vsel %vm969_vm3, %v2725_v7, 0.0  ;;  %v1121_v60 = vld [vmem:[%s3120_s7 + $0x20] sm:$0xff]  ;;  %v1122_v3 = vld [vmem:[%s3120_s7 + $0x28] sm:$0xff]  ;;  %v1124_v5 = vld [vmem:[%s3120_s7 + $0x38] sm:$0xff] }
 0x137   : > { %v1025_v15 = vsel %vm969_vm3, %v2727_v8, 0.0  ;;  %vm904_vm5 = vcmp.ge.f32.partialorder %v872_v6, 0.0  ;;  %v936_v16 = vmul.f32 0.001, %v872_v6  ;;  %v2188_v53 = vpack.c.bf16 %v1118_v51, %v1117_v42 }
 0x138   : > { %v1026_v17 = vadd.f32 %v1025_v15, %v1024_v11  ;;  %vm903_vm6 = vcmp.ge.f32.partialorder %v871_v14, 0.0  ;;  %v935_v48 = vmul.f32 0.001, %v871_v14  ;;  %v2191_v59 = vpack.c.bf16 %v1120_v56, %v1119_v55  ;;  %v1042_v11 = vld [vmem:[%s3119_s6] sm:$0x1]  ;;  %v1643_v56 = vld [vmem:[%s2889_s20 + $0x8] sm:$0xff] }
 0x139   : > { %v2734_v23 = vsel %vm904_vm5, %v872_v6, %v936_v16  ;;  %v2194_v4 = vpack.c.bf16 %v1122_v3, %v1121_v60  ;;  %v1642_v3 = vld [vmem:[%s2889_s20] sm:$0xff] }
 0x13a   : > { %v2736_v24 = vsel %vm903_vm6, %v871_v14, %v935_v48  ;;  %v1028_v29 = vadd.f32 %v1027_v18, %v1026_v17  ;;  %v1031_v31 = vsel %vm969_vm3, %v2734_v23, 0.0  ;;  %v1125_v48 = vld [vmem:[%s3121_s8] sm:$0x1] }
 0x13b   : > { %v1029_v30 = vsel %vm969_vm3, %v2736_v24, 0.0 }
 0x13c   : > { %v1030_v50 = vadd.f32 %v1029_v30, %v1028_v29 }
 0x13e   : > { %v1032_v32 = vadd.f32 %v1031_v31, %v1030_v50 }
 0x140   : > { %v1033_v33 = vrot.slane %v1032_v32, 4 }
 0x142   : > { %v1034_v34 = vadd.f32 %v1033_v33, %v1032_v32 }
 0x144   : > { %v1035_v35 = vrot.slane %v1034_v34, 2 }
 0x146   : > { %v1036_v36 = vadd.f32 %v1035_v35, %v1034_v34  ;;  %v1206_v34 = vlaneseq }
 0x148   : > { %v1037_v41 = vrot.slane %v1036_v36, 1  ;;  %v1207_v35 = vshrl.u32 %v1206_v34, 7  ;;  %v1647_v34 = vld [vmem:[%s2889_s20 + $0x28] sm:$0xff] }
 0x14a   : > { %v1038_v52 = vadd.f32 %v1037_v41, %v1036_v36  ;;  %v1208_v36 = vsub.s32 0, %v1207_v35 }
 0x14c   : > { %v1040_v54 = vmul.f32 0.00390625, %v1038_v52 }
 0x14e   : > { %2100 = vmatmul.mubr.msk.f32.vlgmr.msra.gmra.mrb[0].mxu1 %vm969_vm3, %v1040_v54 }
 0x14f   : > { %2189 = vmatpush3.bf16.msra.mxu1 %v2188_v53  ;;  %2118 = vmatprep.mubr.msk.f32.mxu1 %vm2312_vm1, %v2311_v46  ;;  %v1123_v46 = vld [vmem:[%s3120_s7 + $0x30] sm:$0xff]  ;;  %vm1126_vm1 = vcmask 523264  }
 0x150   : > { %2190 = vmatprep.subr.bf16.mxu1 %v2313_v47  ;;  %v2197_v6 = vpack.c.bf16 %v1124_v5, %v1123_v46 }
 0x153   : > { %2192 = vmatpush3.bf16.msra.mxu1 %v2191_v59 }
 0x154   : > { %2193 = vmatprep.subr.bf16.mxu1 %v2313_v47 }
 0x157   : > { %2195 = vmatpush3.bf16.msra.mxu1 %v2194_v4 }
 0x158   : > { %2196 = vmatprep.subr.bf16.mxu1 %v2313_v47  ;;  %v1242_v47 = vld [vmem:[%s3122_s9] sm:$0xff] }
 0x15b   : > { %2198 = vmatpush3.bf16.msra.mxu1 %v2197_v6 }
 0x15c   : > { %2121 = vmatprep.subr.mxu1 %v1242_v47 }
 0x221   : > { %v1112_v14 = vpop.f32.mrb[0].mxu1 }
 0x222   : > { %v1113_v15 = vadd.f32 %v1112_v14, %v1042_v11  ;;  %v2101_v16 = vpop.f32.mrb[1].mxu1 }
 0x224   : > { %v1116_v17 = vmax.f32 %v1113_v15, 0.0  ;;  %v1645_v15 = vld [vmem:[%s2889_s20 + $0x18] sm:$0xff] }
 0x226   : > { %2119 = vmatmul.mubr.msk.f32.vlgmr.msra.gmra.mrb[2].mxu1 %vm1126_vm1, %v1116_v17 }
 0x227   : > { %2122 = vmatpush3.msra.mxu1 %v1242_v47 }
 0x2f9   : > { %v1196_v18 = vpop.f32.mrb[2].mxu1 }
 0x2fa   : > { %v1197_v29 = vadd.f32 %v1196_v18, %v1125_v48  ;;  %v2120_v30 = vpop.f32.mrb[3].mxu1  ;;  %v1644_v48 = vld [vmem:[%s2889_s20 + $0x10] sm:$0xff] }
 0x2fc   : > { %v1200_v50 = vsub.f32 0.0, %v1197_v29 }
 0x2fe   : > { %v1201_v31 = vmul.f32 1.442695, %v1200_v50 }
 0x300   : > { %2243 = vpow2.f32 %v1201_v31 }
 0x30a   : > { %v2244_v32 = vpop.eup %2243 }
 0x30b   : > { %v1203_v33 = vadd.f32 1.0, %v2244_v32 }
 0x30d   : > { %2245 = vrcp.f32 %v1203_v33 }
 0x317   : > { %v2246_v41 = vpop.eup %2245 }
 0x318   : > { %v2781_v42 = vrot.slane %v2246_v41, %v1208_v36 }
 0x31a   : > { %v1211_v51 = vmul.f32 %v2781_v42, %v2556_v62  ;;  %v1210_v52 = vmul.f32 %v2781_v42, %v2561_v1  ;;  %v1212_v53 = vmul.f32 %v2781_v42, %v2571_v13  ;;  %v1213_v54 = vmul.f32 %v2781_v42, %v2569_v12 }
 0x31b   : > { %v1214_v55 = vmul.f32 %v2781_v42, %v2583_v26  ;;  %v1215_v62 = vmul.f32 %v2781_v42, %v2581_v25  ;;  %v1216_v1 = vmul.f32 %v2781_v42, %v2595_v40  ;;  %v1217_v12 = vmul.f32 %v2781_v42, %v2593_v39 }
 0x31c   : > { %2123 = vmatprep.mubr.msk.f32.mxu1 %vm969_vm3, %v1210_v52  ;;  %v1218_v13 = vmul.f32 %v2781_v42, %v2607_v58  ;;  %v1219_v25 = vmul.f32 %v2781_v42, %v2605_v57  ;;  %v1220_v26 = vmul.f32 %v2781_v42, %v2619_v10  ;;  %v1221_v39 = vmul.f32 %v2781_v42, %v2617_v9 }
 0x31d   : > { %2124 = vmatmul.mubr.msk.f32.vlgmr.msra.gmra.mrb[4].mxu1 %vm969_vm3, %v1211_v51  ;;  %v1222_v40 = vmul.f32 %v2781_v42, %v2631_v28  ;;  %v1223_v57 = vmul.f32 %v2781_v42, %v2629_v27  ;;  %v1224_v58 = vmul.f32 %v2781_v42, %v2643_v44  ;;  %v1225_v9 = vmul.f32 %v2781_v42, %v2641_v43 }
 0x31e   : > { %2126 = vmatprep.mubr.msk.f32.mxu1 %vm969_vm3, %v1212_v53  ;;  %v1226_v10 = vmul.f32 %v2781_v42, %v2655_v2  ;;  %v1227_v27 = vmul.f32 %v2781_v42, %v2653_v0  ;;  %v1228_v28 = vmul.f32 %v2781_v42, %v2667_v20  ;;  %v1229_v43 = vmul.f32 %v2781_v42, %v2665_v19 }
 0x31f   : > { %v1230_v44 = vmul.f32 %v2781_v42, %v2679_v38  ;;  %v1231_v0 = vmul.f32 %v2781_v42, %v2677_v37  ;;  %v1232_v2 = vmul.f32 %v2781_v42, %v2691_v63  ;;  %v1233_v19 = vmul.f32 %v2781_v42, %v2689_v61 }
 0x320   : > { %v1234_v20 = vmul.f32 %v2781_v42, %v2703_v22  ;;  %v1235_v37 = vmul.f32 %v2781_v42, %v2701_v21  ;;  %v1236_v38 = vmul.f32 %v2781_v42, %v2715_v49  ;;  %v1237_v61 = vmul.f32 %v2781_v42, %v2713_v45  ;;  %v2882_v49 = vld [vmem:[%s3123_s10] ss:$0 sm:$0xff] }
 0x321   : > { %2127 = vmatmul.mubr.msk.f32.gmra.mrb[6].mxu1 %vm969_vm3, %v1213_v54  ;;  %v1238_v63 = vmul.f32 %v2781_v42, %v2727_v8  ;;  %v1239_v21 = vmul.f32 %v2781_v42, %v2725_v7  ;;  %v1240_v22 = vmul.f32 %v2781_v42, %v2736_v24  ;;  %v1241_v45 = vmul.f32 %v2781_v42, %v2734_v23  ;;  %v2895_v8 = vld [vmem:[%s3124_s11] ss:$0 sm:$0xff] }
 0x322   : > { %2129 = vmatprep.mubr.msk.f32.mxu1 %vm969_vm3, %v1214_v55  ;;  %v1646_v42 = vld [vmem:[%s2889_s20 + $0x20] sm:$0xff] }
 0x325   : > { %2130 = vmatmul.mubr.msk.f32.gmra.mrb[8].mxu1 %vm969_vm3, %v1215_v62 }
 0x326   : > { %2132 = vmatprep.mubr.msk.f32.mxu1 %vm969_vm3, %v1216_v1 }
 0x329   : > { %2133 = vmatmul.mubr.msk.f32.gmra.mrb[10].mxu1 %vm969_vm3, %v1217_v12  ;;  %v1649_v12 = vld [vmem:[%s2889_s20 + $0x38] sm:$0xff] }
 0x32a   : > { %2135 = vmatprep.mubr.msk.f32.mxu1 %vm969_vm3, %v1218_v13 }
 0x32d   : > { %2136 = vmatmul.mubr.msk.f32.gmra.mrb[12].mxu1 %vm969_vm3, %v1219_v25 }
 0x32e   : > { %2138 = vmatprep.mubr.msk.f32.mxu1 %vm969_vm3, %v1220_v26 }
 0x331   : > { %2139 = vmatmul.mubr.msk.f32.gmra.mrb[14].mxu1 %vm969_vm3, %v1221_v39  ;;  %v1648_v39 = vld [vmem:[%s2889_s20 + $0x30] sm:$0xff] }
 0x332   : > { %2141 = vmatprep.mubr.msk.f32.mxu1 %vm969_vm3, %v1222_v40 }
 0x335   : > { %2142 = vmatmul.mubr.msk.f32.gmra.mrb[16].mxu1 %vm969_vm3, %v1223_v57 }
 0x336   : > { %2144 = vmatprep.mubr.msk.f32.mxu1 %vm969_vm3, %v1224_v58 }
 0x339   : > { %2145 = vmatmul.mubr.msk.f32.gmra.mrb[18].mxu1 %vm969_vm3, %v1225_v9 }
 0x33a   : > { %2147 = vmatprep.mubr.msk.f32.mxu1 %vm969_vm3, %v1226_v10 }
 0x33d   : > { %2148 = vmatmul.mubr.msk.f32.gmra.mrb[20].mxu1 %vm969_vm3, %v1227_v27 }
 0x33e   : > { %2150 = vmatprep.mubr.msk.f32.mxu1 %vm969_vm3, %v1228_v28 }
 0x341   : > { %2151 = vmatmul.mubr.msk.f32.gmra.mrb[22].mxu1 %vm969_vm3, %v1229_v43  ;;  %v1651_v43 = vld [vmem:[%s2889_s20 + $0x48] sm:$0xff] }
 0x342   : > { %2153 = vmatprep.mubr.msk.f32.mxu1 %vm969_vm3, %v1230_v44 }
 0x345   : > { %2154 = vmatmul.mubr.msk.f32.gmra.mrb[24].mxu1 %vm969_vm3, %v1231_v0 }
 0x346   : > { %2156 = vmatprep.mubr.msk.f32.mxu1 %vm969_vm3, %v1232_v2 }
 0x349   : > { %2157 = vmatmul.mubr.msk.f32.gmra.mrb[26].mxu1 %vm969_vm3, %v1233_v19  ;;  %v1650_v19 = vld [vmem:[%s2889_s20 + $0x40] sm:$0xff] }
 0x34a   : > { %2159 = vmatprep.mubr.msk.f32.mxu1 %vm969_vm3, %v1234_v20 }
 0x34d   : > { %2160 = vmatmul.mubr.msk.f32.gmra.mrb[28].mxu1 %vm969_vm3, %v1235_v37 }
 0x34e   : > { %2162 = vmatprep.mubr.msk.f32.mxu1 %vm969_vm3, %v1236_v38 }
 0x351   : > { %2163 = vmatmul.mubr.msk.f32.gmra.mrb[30].mxu1 %vm969_vm3, %v1237_v61 }
 0x352   : > { %2165 = vmatprep.mubr.msk.f32.mxu1 %vm969_vm3, %v1238_v63 }
 0x355   : > { %2166 = vmatmul.mubr.msk.f32.gmra.mrb[32].mxu1 %vm969_vm3, %v1239_v21 }
 0x356   : > { %2168 = vmatprep.mubr.msk.f32.mxu1 %vm969_vm3, %v1240_v22 }
 0x359   : > { %2169 = vmatmul.mubr.msk.f32.gmra.mrb[34].mxu1 %vm969_vm3, %v1241_v45  ;;  %vm1738_vm3 = vcmask 261120   ;;  %v1653_v45 = vld [vmem:[%s2889_s20 + $0x58] sm:$0xff] }
 0x3f0   : > { %v2125_v7 = vpop.f32.mrb[4].mxu1 }
 0x3f1   : > { %v1572_v23 = vmul.f32 %v2125_v7, %v2882_v49  ;;  %v1405_v24 = vpop.f32.mrb[5].mxu1 }
 0x3f2   : > { %v1571_v59 = vmul.f32 %v2882_v49, %v1405_v24 }
 0x3f3   : > { %v1611_v60 = vadd.f32 %v2895_v8, %v1572_v23 }
 0x3f4   : > { %v1610_v4 = vadd.f32 %v2895_v8, %v1571_v59  ;;  %v2128_v46 = vpop.f32.mrb[6].mxu1 }
 0x3f5   : > { %v1675_v5 = vadd.f32 %v1643_v56, %v1611_v60  ;;  %v1574_v6 = vmul.f32 %v2128_v46, %v2882_v49  ;;  %v1415_v11 = vpop.f32.mrb[7].mxu1  ;;  %v1652_v56 = vld [vmem:[%s2889_s20 + $0x50] sm:$0xff] }
 0x3f6   : > { %v1674_v14 = vadd.f32 %v1642_v3, %v1610_v4  ;;  %v1573_v16 = vmul.f32 %v2882_v49, %v1415_v11  ;;  %v1655_v11 = vld [vmem:[%s2889_s20 + $0x68] sm:$0xff] }
 0x3f7   : > { %v1707_v17 = vmax.f32 %v1675_v5, 0.0  ;;  %v1613_v47 = vadd.f32 %v2895_v8, %v1574_v6 }
 0x3f8   : > { %v1706_v18 = vmax.f32 %v1674_v14, 0.0  ;;  %v1612_v29 = vadd.f32 %v2895_v8, %v1573_v16  ;;  %v2131_v30 = vpop.f32.mrb[8].mxu1 }
 0x3f9   : > { %1740 = vst.msk [vmem:[%s2911_s18 + $0x8] sm:$0xff] %vm1738_vm3, %v1707_v17  ;;  %v1677_v50 = vadd.f32 %v1645_v15, %v1613_v47  ;;  %v1576_v31 = vmul.f32 %v2131_v30, %v2882_v49  ;;  %v1425_v32 = vpop.f32.mrb[9].mxu1  ;;  %v1654_v17 = vld [vmem:[%s2889_s20 + $0x60] sm:$0xff] }
 0x3fa   : > { %1739 = vst.msk [vmem:[%s2911_s18] sm:$0xff] %vm1738_vm3, %v1706_v18  ;;  %v1676_v33 = vadd.f32 %v1644_v48, %v1612_v29  ;;  %v1575_v35 = vmul.f32 %v2882_v49, %v1425_v32  ;;  %v1657_v32 = vld [vmem:[%s2889_s20 + $0x78] sm:$0xff] }
 0x3fb   : > { %v1709_v36 = vmax.f32 %v1677_v50, 0.0  ;;  %v1615_v41 = vadd.f32 %v2895_v8, %v1576_v31 }
 0x3fc   : > { %v1708_v51 = vmax.f32 %v1676_v33, 0.0  ;;  %v1614_v52 = vadd.f32 %v2895_v8, %v1575_v35  ;;  %v2134_v53 = vpop.f32.mrb[10].mxu1 }
 0x3fd   : > { %1742 = vst.msk [vmem:[%s2911_s18 + $0x18] sm:$0xff] %vm1738_vm3, %v1709_v36  ;;  %v1679_v54 = vadd.f32 %v1647_v34, %v1615_v41  ;;  %v1578_v55 = vmul.f32 %v2134_v53, %v2882_v49  ;;  %v1435_v62 = vpop.f32.mrb[11].mxu1  ;;  %v1656_v36 = vld [vmem:[%s2889_s20 + $0x70] sm:$0xff] }
 0x3fe   : > { %1741 = vst.msk [vmem:[%s2911_s18 + $0x10] sm:$0xff] %vm1738_vm3, %v1708_v51  ;;  %v1678_v1 = vadd.f32 %v1646_v42, %v1614_v52  ;;  %v1577_v13 = vmul.f32 %v2882_v49, %v1435_v62  ;;  %v1659_v62 = vld [vmem:[%s2889_s20 + $0x88] sm:$0xff] }
 0x3ff   : > { %v1711_v25 = vmax.f32 %v1679_v54, 0.0  ;;  %v1617_v26 = vadd.f32 %v2895_v8, %v1578_v55 }
 0x400   : > { %v1710_v40 = vmax.f32 %v1678_v1, 0.0  ;;  %v1616_v57 = vadd.f32 %v2895_v8, %v1577_v13  ;;  %v2137_v58 = vpop.f32.mrb[12].mxu1 }
 0x401   : > { %1744 = vst.msk [vmem:[%s2911_s18 + $0x28] sm:$0xff] %vm1738_vm3, %v1711_v25  ;;  %v1681_v9 = vadd.f32 %v1649_v12, %v1617_v26  ;;  %v1580_v10 = vmul.f32 %v2137_v58, %v2882_v49  ;;  %v1445_v27 = vpop.f32.mrb[13].mxu1  ;;  %v1658_v25 = vld [vmem:[%s2889_s20 + $0x80] sm:$0xff] }
 0x402   : > { %1743 = vst.msk [vmem:[%s2911_s18 + $0x20] sm:$0xff] %vm1738_vm3, %v1710_v40  ;;  %v1680_v28 = vadd.f32 %v1648_v39, %v1616_v57  ;;  %v1579_v44 = vmul.f32 %v2882_v49, %v1445_v27  ;;  %v1661_v27 = vld [vmem:[%s2889_s20 + $0x98] sm:$0xff] }
 0x403   : > { %v1713_v0 = vmax.f32 %v1681_v9, 0.0  ;;  %v1619_v2 = vadd.f32 %v2895_v8, %v1580_v10 }
 0x404   : > { %v1712_v20 = vmax.f32 %v1680_v28, 0.0  ;;  %v1618_v37 = vadd.f32 %v2895_v8, %v1579_v44  ;;  %v2140_v38 = vpop.f32.mrb[14].mxu1 }
 0x405   : > { %1746 = vst.msk [vmem:[%s2911_s18 + $0x38] sm:$0xff] %vm1738_vm3, %v1713_v0  ;;  %v1683_v61 = vadd.f32 %v1651_v43, %v1619_v2  ;;  %v1582_v63 = vmul.f32 %v2140_v38, %v2882_v49  ;;  %v1455_v21 = vpop.f32.mrb[15].mxu1  ;;  %v1660_v0 = vld [vmem:[%s2889_s20 + $0x90] sm:$0xff] }
 0x406   : > { %1745 = vst.msk [vmem:[%s2911_s18 + $0x30] sm:$0xff] %vm1738_vm3, %v1712_v20  ;;  %v1682_v22 = vadd.f32 %v1650_v19, %v1618_v37  ;;  %v1581_v7 = vmul.f32 %v2882_v49, %v1455_v21  ;;  %v1663_v21 = vld [vmem:[%s2889_s20 + $0xa8] sm:$0xff] }
 0x407   : > { %v1715_v23 = vmax.f32 %v1683_v61, 0.0  ;;  %v1621_v24 = vadd.f32 %v2895_v8, %v1582_v63 }
 0x408   : > { %v1714_v59 = vmax.f32 %v1682_v22, 0.0  ;;  %v1620_v60 = vadd.f32 %v2895_v8, %v1581_v7  ;;  %v2143_v3 = vpop.f32.mrb[16].mxu1 }
 0x409   : > { %1748 = vst.msk [vmem:[%s2911_s18 + $0x48] sm:$0xff] %vm1738_vm3, %v1715_v23  ;;  %v1685_v4 = vadd.f32 %v1653_v45, %v1621_v24  ;;  %v1584_v46 = vmul.f32 %v2143_v3, %v2882_v49  ;;  %v1465_v5 = vpop.f32.mrb[17].mxu1  ;;  %v1662_v23 = vld [vmem:[%s2889_s20 + $0xa0] sm:$0xff] }
 0x40a   : > { %1747 = vst.msk [vmem:[%s2911_s18 + $0x40] sm:$0xff] %vm1738_vm3, %v1714_v59  ;;  %v1684_v6 = vadd.f32 %v1652_v56, %v1620_v60  ;;  %v1583_v14 = vmul.f32 %v2882_v49, %v1465_v5  ;;  %v1665_v5 = vld [vmem:[%s2889_s20 + $0xb8] sm:$0xff] }
 0x40b   : > { %v1717_v15 = vmax.f32 %v1685_v4, 0.0  ;;  %v1623_v16 = vadd.f32 %v2895_v8, %v1584_v46 }
 0x40c   : > { %v1716_v47 = vmax.f32 %v1684_v6, 0.0  ;;  %v1622_v48 = vadd.f32 %v2895_v8, %v1583_v14  ;;  %v2146_v18 = vpop.f32.mrb[18].mxu1 }
 0x40d   : > { %1750 = vst.msk [vmem:[%s2911_s18 + $0x58] sm:$0xff] %vm1738_vm3, %v1717_v15  ;;  %v1687_v29 = vadd.f32 %v1655_v11, %v1623_v16  ;;  %v1586_v30 = vmul.f32 %v2146_v18, %v2882_v49  ;;  %v1475_v50 = vpop.f32.mrb[19].mxu1  ;;  %v1664_v15 = vld [vmem:[%s2889_s20 + $0xb0] sm:$0xff] }
 0x40e   : > { %1749 = vst.msk [vmem:[%s2911_s18 + $0x50] sm:$0xff] %vm1738_vm3, %v1716_v47  ;;  %v1686_v31 = vadd.f32 %v1654_v17, %v1622_v48  ;;  %v1585_v33 = vmul.f32 %v2882_v49, %v1475_v50  ;;  %v1667_v50 = vld [vmem:[%s2889_s20 + $0xc8] sm:$0xff] }
 0x40f   : > { %v1719_v34 = vmax.f32 %v1687_v29, 0.0  ;;  %v1625_v35 = vadd.f32 %v2895_v8, %v1586_v30 }
 0x410   : > { %v1718_v41 = vmax.f32 %v1686_v31, 0.0  ;;  %v1624_v42 = vadd.f32 %v2895_v8, %v1585_v33  ;;  %v2149_v51 = vpop.f32.mrb[20].mxu1 }
 0x411   : > { %1752 = vst.msk [vmem:[%s2911_s18 + $0x68] sm:$0xff] %vm1738_vm3, %v1719_v34  ;;  %v1689_v52 = vadd.f32 %v1657_v32, %v1625_v35  ;;  %v1588_v53 = vmul.f32 %v2149_v51, %v2882_v49  ;;  %v1485_v54 = vpop.f32.mrb[21].mxu1  ;;  %v1666_v34 = vld [vmem:[%s2889_s20 + $0xc0] sm:$0xff] }
 0x412   : > { %1751 = vst.msk [vmem:[%s2911_s18 + $0x60] sm:$0xff] %vm1738_vm3, %v1718_v41  ;;  %v1688_v55 = vadd.f32 %v1656_v36, %v1624_v42  ;;  %v1587_v1 = vmul.f32 %v2882_v49, %v1485_v54  ;;  %v1669_v54 = vld [vmem:[%s2889_s20 + $0xd8] sm:$0xff] }
 0x413   : > { %v1721_v12 = vmax.f32 %v1689_v52, 0.0  ;;  %v1627_v13 = vadd.f32 %v2895_v8, %v1588_v53 }
 0x414   : > { %v1720_v26 = vmax.f32 %v1688_v55, 0.0  ;;  %v1626_v39 = vadd.f32 %v2895_v8, %v1587_v1  ;;  %v2152_v40 = vpop.f32.mrb[22].mxu1 }
 0x415   : > { %1754 = vst.msk [vmem:[%s2911_s18 + $0x78] sm:$0xff] %vm1738_vm3, %v1721_v12  ;;  %v1691_v57 = vadd.f32 %v1659_v62, %v1627_v13  ;;  %v1590_v58 = vmul.f32 %v2152_v40, %v2882_v49  ;;  %v1495_v9 = vpop.f32.mrb[23].mxu1  ;;  %v1668_v12 = vld [vmem:[%s2889_s20 + $0xd0] sm:$0xff] }
 0x416   : > { %1753 = vst.msk [vmem:[%s2911_s18 + $0x70] sm:$0xff] %vm1738_vm3, %v1720_v26  ;;  %v1690_v10 = vadd.f32 %v1658_v25, %v1626_v39  ;;  %v1589_v28 = vmul.f32 %v2882_v49, %v1495_v9  ;;  %v1671_v9 = vld [vmem:[%s2889_s20 + $0xe8] sm:$0xff] }
 0x417   : > { %v1723_v43 = vmax.f32 %v1691_v57, 0.0  ;;  %v1629_v44 = vadd.f32 %v2895_v8, %v1590_v58 }
 0x418   : > { %v1722_v2 = vmax.f32 %v1690_v10, 0.0  ;;  %v1628_v19 = vadd.f32 %v2895_v8, %v1589_v28  ;;  %v2155_v20 = vpop.f32.mrb[24].mxu1 }
 0x419   : > { %1756 = vst.msk [vmem:[%s2911_s18 + $0x88] sm:$0xff] %vm1738_vm3, %v1723_v43  ;;  %v1693_v37 = vadd.f32 %v1661_v27, %v1629_v44  ;;  %v1592_v38 = vmul.f32 %v2155_v20, %v2882_v49  ;;  %v1505_v61 = vpop.f32.mrb[25].mxu1  ;;  %v1670_v43 = vld [vmem:[%s2889_s20 + $0xe0] sm:$0xff] }
 0x41a   : > { %1755 = vst.msk [vmem:[%s2911_s18 + $0x80] sm:$0xff] %vm1738_vm3, %v1722_v2  ;;  %v1692_v63 = vadd.f32 %v1660_v0, %v1628_v19  ;;  %v1591_v22 = vmul.f32 %v2882_v49, %v1505_v61  ;;  %v1673_v61 = vld [vmem:[%s2889_s20 + $0xf8] sm:$0xff] }
 0x41b   : > { %v1725_v45 = vmax.f32 %v1693_v37, 0.0  ;;  %v1631_v7 = vadd.f32 %v2895_v8, %v1592_v38 }
 0x41c   : > { %v1724_v24 = vmax.f32 %v1692_v63, 0.0  ;;  %v1630_v56 = vadd.f32 %v2895_v8, %v1591_v22  ;;  %v2158_v59 = vpop.f32.mrb[26].mxu1 }
 0x41d   : > { %1758 = vst.msk [vmem:[%s2911_s18 + $0x98] sm:$0xff] %vm1738_vm3, %v1725_v45  ;;  %v1695_v60 = vadd.f32 %v1663_v21, %v1631_v7  ;;  %v1594_v3 = vmul.f32 %v2158_v59, %v2882_v49  ;;  %v1515_v4 = vpop.f32.mrb[27].mxu1  ;;  %v1672_v45 = vld [vmem:[%s2889_s20 + $0xf0] sm:$0xff]  ;;  %s2247_s20 = scalar_lea.vmem %s3064_s15, 4096 }
 0x41e   : > { %1757 = vst.msk [vmem:[%s2911_s18 + $0x90] sm:$0xff] %vm1738_vm3, %v1724_v24  ;;  %v1694_v46 = vadd.f32 %v1662_v23, %v1630_v56  ;;  %v1593_v6 = vmul.f32 %v2882_v49, %v1515_v4  ;;  %p2248_p11 = scmp.ne.s32.totalorder %s3064_s15, %s2247_s20  ;;  %p2255_p1 = scmp.lt.s32.totalorder %s2253_s26, %s2247_s20 }
 0x41f   : > { %v1727_v11 = vmax.f32 %v1695_v60, 0.0  ;;  %v1633_v14 = vadd.f32 %v2895_v8, %v1594_v3 }
 0x420   : > { %v1726_v16 = vmax.f32 %v1694_v46, 0.0  ;;  %v1632_v17 = vadd.f32 %v2895_v8, %v1593_v6  ;;  %v2161_v47 = vpop.f32.mrb[28].mxu1  ;;  %p2249_p12 = pnand %p2248_p11, %p2420_p5  ;;  %p2256_p2 = por %p2255_p1, %p2254_p0 }
 0x421   : > { %1760 = vst.msk [vmem:[%s2911_s18 + $0xa8] sm:$0xff] %vm1738_vm3, %v1727_v11  ;;  %v1697_v48 = vadd.f32 %v1665_v5, %v1633_v14  ;;  %v1596_v18 = vmul.f32 %v2161_v47, %v2882_v49  ;;  %v1525_v29 = vpop.f32.mrb[29].mxu1 }
 0x422   : > { %1759 = vst.msk [vmem:[%s2911_s18 + $0xa0] sm:$0xff] %vm1738_vm3, %v1726_v16  ;;  %v1696_v30 = vadd.f32 %v1664_v15, %v1632_v17  ;;  %v1595_v31 = vmul.f32 %v2882_v49, %v1525_v29  ;;  %p2250_p13 = pneg %p2249_p12 }
 0x423   : > { %v1729_v32 = vmax.f32 %v1697_v48, 0.0  ;;  %v1635_v33 = vadd.f32 %v2895_v8, %v1596_v18 }
 0x424   : > { %v1728_v35 = vmax.f32 %v1696_v30, 0.0  ;;  %v1634_v36 = vadd.f32 %v2895_v8, %v1595_v31  ;;  %v2164_v41 = vpop.f32.mrb[30].mxu1  ;;  %p2257_p3 = pnand %p2256_p2, %p2250_p13 }
 0x425   : > { %1762 = vst.msk [vmem:[%s2911_s18 + $0xb8] sm:$0xff] %vm1738_vm3, %v1729_v32  ;;  %v1699_v42 = vadd.f32 %v1667_v50, %v1635_v33  ;;  %v1598_v51 = vmul.f32 %v2164_v41, %v2882_v49  ;;  %v1535_v52 = vpop.f32.mrb[31].mxu1 }
 0x426   : > { %1761 = vst.msk [vmem:[%s2911_s18 + $0xb0] sm:$0xff] %vm1738_vm3, %v1728_v35  ;;  %v1698_v53 = vadd.f32 %v1666_v34, %v1634_v36  ;;  %v1597_v55 = vmul.f32 %v2882_v49, %v1535_v52 }
 0x427   : > { %v1731_v62 = vmax.f32 %v1699_v42, 0.0  ;;  %v1637_v1 = vadd.f32 %v2895_v8, %v1598_v51 }
 0x428   : > { %v1730_v13 = vmax.f32 %v1698_v53, 0.0  ;;  %v1636_v25 = vadd.f32 %v2895_v8, %v1597_v55  ;;  %v2167_v26 = vpop.f32.mrb[32].mxu1 }
 0x429   : > { %1764 = vst.msk [vmem:[%s2911_s18 + $0xc8] sm:$0xff] %vm1738_vm3, %v1731_v62  ;;  %v1701_v39 = vadd.f32 %v1669_v54, %v1637_v1  ;;  %v1600_v40 = vmul.f32 %v2167_v26, %v2882_v49  ;;  %v1545_v57 = vpop.f32.mrb[33].mxu1 }
 0x42a   : > { %1763 = vst.msk [vmem:[%s2911_s18 + $0xc0] sm:$0xff] %vm1738_vm3, %v1730_v13  ;;  %v1700_v58 = vadd.f32 %v1668_v12, %v1636_v25  ;;  %v1599_v10 = vmul.f32 %v2882_v49, %v1545_v57 }
 0x42b   : > { %v1733_v27 = vmax.f32 %v1701_v39, 0.0  ;;  %v1639_v28 = vadd.f32 %v2895_v8, %v1600_v40 }
 0x42c   : > { %v1732_v44 = vmax.f32 %v1700_v58, 0.0  ;;  %v1638_v0 = vadd.f32 %v2895_v8, %v1599_v10  ;;  %v2170_v2 = vpop.f32.mrb[34].mxu1 }
 0x42d   : > { %1766 = vst.msk [vmem:[%s2911_s18 + $0xd8] sm:$0xff] %vm1738_vm3, %v1733_v27  ;;  %v1703_v19 = vadd.f32 %v1671_v9, %v1639_v28  ;;  %v1602_v20 = vmul.f32 %v2170_v2, %v2882_v49  ;;  %v1555_v37 = vpop.f32.mrb[35].mxu1 }
 0x42e   : > { %1765 = vst.msk [vmem:[%s2911_s18 + $0xd0] sm:$0xff] %vm1738_vm3, %v1732_v44  ;;  %v1702_v38 = vadd.f32 %v1670_v43, %v1638_v0  ;;  %v1601_v63 = vmul.f32 %v2882_v49, %v1555_v37 }
 0x42f   : > { %v1735_v21 = vmax.f32 %v1703_v19, 0.0  ;;  %v1641_v22 = vadd.f32 %v2895_v8, %v1602_v20 }
 0x430   : > { %v1734_v7 = vmax.f32 %v1702_v38, 0.0  ;;  %v1640_v23 = vadd.f32 %v2895_v8, %v1601_v63 }
 0x431   : > { %1768 = vst.msk [vmem:[%s2911_s18 + $0xe8] sm:$0xff] %vm1738_vm3, %v1735_v21  ;;  %v1705_v24 = vadd.f32 %v1673_v61, %v1641_v22 }
 0x432   : > { %1767 = vst.msk [vmem:[%s2911_s18 + $0xe0] sm:$0xff] %vm1738_vm3, %v1734_v7  ;;  %v1704_v56 = vadd.f32 %v1672_v45, %v1640_v23 }
 0x433   : > { %v1737_v49 = vmax.f32 %v1705_v24, 0.0 }
 0x434   : > { %v1736_v8 = vmax.f32 %v1704_v56, 0.0 }
 0x435   : > { %1770 = vst.msk [vmem:[%s2911_s18 + $0xf8] sm:$0xff] %vm1738_vm3, %v1737_v49 }
 0x436   : > { %1769 = vst.msk [vmem:[%s2911_s18 + $0xf0] sm:$0xff] %vm1738_vm3, %v1736_v8 }
 0x437   : > { %2260 = shalt.err (!%p2257_p3)
}
 0x438   : > { %s2261_s28 = scalar_lea.hbm %s3062_s29, 4096  ;;  %s2265_s19 = scalar_lea.hbm %s3125_s12, 8192 }
 0x439   : > { %p2262_p4 = scmp.ne.s32.totalorder %s3062_s29, %s2261_s28  ;;  %p2266_p9 = scmp.lt.u32.totalorder %s3062_s29, %s3125_s12 }
 0x43a   : > { %p2267_p10 = scmp.lt.u32.totalorder %s2265_s19, %s2261_s28  ;;  %p2269_p12 = scmp.lt.u32.totalorder %s2261_s28, %s3062_s29 }
 0x43b   : > { %p2263_p7 = pnand %p2262_p4, %p2420_p5 }
 0x43c   : > { %p2268_p11 = por %p2267_p10, %p2266_p9 }
 0x43d   : > { %p2264_p8 = pneg %p2263_p7 }
 0x43e   : > { %p2270_p13 = por %p2269_p12, %p2268_p11 }
 0x440   : > { %p2271_p0 = pnand %p2270_p13, %p2264_p8 }
 0x442   : > { %2274 = shalt.err (!%p2271_p0)
}
 0x443   : > { %s2315_s20 = smov 128   ;;  %s2316_s26 = smov 8  }
 0x444   : > { %2199 = dma.vmem_to_hbm [thread:$0]  (%p2420_p5), %s3064_s15, 4096, %s3062_s29, %s3072_s25, %s2315_s20, %s2315_s20, %s2316_s26  }
 0x445 PF: > { %p2205_p1 = scmp.ge.s32.totalorder %s2309_s24, 2  ;;  %s1800_s18 = sand.u32 1, %s2297_s21  }
 0x446   : > { %s1801_s28 = scalar_lea.sflag [#allocation3], %s1800_s18 }
 0x447   : > { %p2202_p2 = pnand %p2205_p1, %p2424_p6 }
 0x449   : > { %2292 = dma.done.wait (!%p2202_p2), %s1801_s28, 4096  }
 0x44a   : > { %2294 = vsyncadd (!%p2202_p2), %s1801_s28, 4294963200  ;;  %s3129_s16 = sld [smem:[#allocation5_spill]]  ;;  %p22_p3 = scmp.ge.s32.totalorder %s2407_s27, 4  }
 0x44b   : > { %s3130_s21 = smov %s2301_s22  ;;  %s3131_s22 = smov %s2305_s23 }
 0x44c   : > { %s3133_s24 = smov %s2407_s27  ;;  %24 = sbr.rel (!%p22_p3) target bundleno = 3 (0x3), region = 106 }
 0x450   : > { %s3132_s23 = smov %s3129_s16 }
 0x453   :  { %1806 = vsyncpa [#allocation3], 1 }
 0x454   :  { %1808 = vsyncpa [#allocation3 + $0x1], 1 }

</bundles_post_ra>
